<compile_context>
chip_gen: v7x
topology: tpu7x:2x2x1
jax: 0.10.0
libtpu: 0.0.40
codegen_flags: <defaults>
</compile_context>

<pallas_src>
import jax
import jax.numpy as jnp
from jax.experimental import pallas as pl
from jax.experimental.pallas import tpu as pltpu


# ----------------------------------------------------------------------------
# Fused decoder kernel: input projection + GRU recurrence + deferred attention.
# ----------------------------------------------------------------------------
def _decoder_kernel(x2d_ref, h0_ref, wi3_ref, bi3_ref, wh3_ref, bhn_ref,
                    mem2d_ref, wa_ref, wc_ref, who_ref,
                    dec_ref, align_ref, hfin_ref,
                    hall_scr):
    B, T, H = dec_ref.shape
    S = align_ref.shape[2]
    f32 = jnp.float32
    bf16 = jnp.bfloat16

    # ---- hoisted input projection: ONE matmul for all timesteps -------------
    # gi[t*B+b, :] = x_t[b] @ W_i[E,3H] + [b_ir+b_hr | b_iz+b_hz | b_in]
    gi = jnp.dot(x2d_ref[...], wi3_ref[...],
                 preferred_element_type=f32) + bi3_ref[...]          # [T*B, 3H] f32

    # ---- fold attention weights into the memory bank (flattened over B*S) ---
    # score = (h @ W_a) . mem[s]  ==  h . (mem[s] @ W_a^T)   -> mem_a
    # ctx @ W_c = sum_s align[s] * (mem[s] @ W_c)            -> mem_c
    mem2d = mem2d_ref[...]                                           # [B*S, H] bf16
    mem_a = jax.lax.dot_general(mem2d, wa_ref[...],
                                (((1,), (1,)), ((), ())),
                                preferred_element_type=f32).astype(bf16)  # [B*S, H]
    mem_c = jnp.dot(mem2d, wc_ref[...],
                    preferred_element_type=f32).astype(bf16)         # [B*S, H]

    wh3 = wh3_ref[...]                                               # [H, 3H] bf16
    bhn = bhn_ref[...]                                               # [1, H]  f32 (b_hn)

    # ---- serial GRU recurrence (attention deferred) --------------------------
    h = h0_ref[...]                                                  # [B, H] f32
    h_bf = h.astype(bf16)
    for t in range(T):                       # T small & static -> unrolled
        gh = jnp.dot(h_bf, wh3, preferred_element_type=f32)          # [B, 3H]
        g_t = gi[t * B:(t + 1) * B, :]                               # [B, 3H]
        r = jax.nn.sigmoid(g_t[:, 0:H] + gh[:, 0:H])
        z = jax.nn.sigmoid(g_t[:, H:2 * H] + gh[:, H:2 * H])
        n = jnp.tanh(g_t[:, 2 * H:] + r * (gh[:, 2 * H:] + bhn))     # b_hn inside r*(.)
        h = (1.0 - z) * n + z * h                                    # [B, H]
        h_bf = h.astype(bf16)                 # single cast: next-step matmul + stash
        hall_scr[t] = h_bf

    hfin_ref[...] = h

    # ---- batched attention for ALL timesteps (MXU, off the serial path) -----
    h_all = hall_scr[...]                                            # [T, B, H] bf16
    who = who_ref[...]                                               # [H, H] bf16
    for b in range(B):                       # B small & static -> unrolled
        hb = h_all[:, b, :]                                          # [T, H] bf16
        mem_a_b = mem_a[b * S:(b + 1) * S, :]                        # [S, H] bf16
        mem_c_b = mem_c[b * S:(b + 1) * S, :]                        # [S, H] bf16

        scores = jax.lax.dot_general(hb, mem_a_b,
                                     (((1,), (1,)), ((), ())),
                                     preferred_element_type=f32)     # [T, S]
        m = jnp.max(scores, axis=-1, keepdims=True)
        e = jnp.exp(scores - m)
        align = e / jnp.sum(e, axis=-1, keepdims=True)               # exact softmax

        ctx_c = jnp.dot(align.astype(bf16), mem_c_b,
                        preferred_element_type=f32)                  # (align@mem)@W_c
        hproj = jnp.dot(hb, who, preferred_element_type=f32)         # h @ W_ho
        dec_ref[b] = jnp.tanh(ctx_c + hproj)                         # [T, H] dense store
        align_ref[b] = align                                         # [T, S] dense store


# ----------------------------------------------------------------------------
# Wrapper around pallas_call (single invocation; everything resident in VMEM).
# ----------------------------------------------------------------------------
def decoder_fused(x2d_bf, h0, mem2d_bf, params, T, B, S):
    E = x2d_bf.shape[1]
    H = h0.shape[1]

    def full(shape):
        nd = len(shape)
        return pl.BlockSpec(shape, lambda i, nd=nd: (0,) * nd)

    return pl.pallas_call(
        _decoder_kernel,
        out_shape=(jax.ShapeDtypeStruct((B, T, H), jnp.float32),     # attn_h (dec outs)
                   jax.ShapeDtypeStruct((B, T, S), jnp.float32),     # alignments
                   jax.ShapeDtypeStruct((B, H), jnp.float32)),       # final hidden
        grid_spec=pltpu.PrefetchScalarGridSpec(
            num_scalar_prefetch=0,
            grid=(1,),
            in_specs=[
                full((T * B, E)),        # x2d   (embedded tgt, flattened, bf16)
                full((B, H)),            # h0                       (f32)
                full((E, 3 * H)),        # wi3                      (bf16)
                full((1, 3 * H)),        # bi3                      (f32)
                full((H, 3 * H)),        # wh3                      (bf16)
                full((1, H)),            # bhn                      (f32)
                full((B * S, H)),        # memory bank, flattened   (bf16)
                full((H, H)),            # wa                       (bf16)
                full((H, H)),            # wc                       (bf16)
                full((H, H)),            # who                      (bf16)
            ],
            out_specs=[
                full((B, T, H)),
                full((B, T, S)),
                full((B, H)),
            ],
            scratch_shapes=[pltpu.VMEM((T, B, H), jnp.bfloat16)],    # stashed h_t
        ),
        compiler_params=pltpu.CompilerParams(
            dimension_semantics=("arbitrary",)),
    )(x2d_bf, h0, params["wi3"], params["bi3"], params["wh3"], params["bhn"],
      mem2d_bf, params["wa"], params["wc"], params["who"])


# ----------------------------------------------------------------------------
# TextDecoder forward: embedding lookup (glue) -> fused Pallas decoder kernel.
# Returns (decoder_outputs [T,B,H], attn weights [T,B,S], final hidden [B,H]).
# ----------------------------------------------------------------------------
def text_decoder_forward(tgt_ids, memory_bank, h0, params):
    T, B = tgt_ids.shape
    S = memory_bank.shape[0]
    emb = params["emb_table"][tgt_ids]                        # [T, B, E] (glue gather)
    x2d = emb.reshape(T * B, emb.shape[-1]).astype(jnp.bfloat16)
    mem2d = jnp.transpose(memory_bank, (1, 0, 2)).reshape(
        B * S, memory_bank.shape[-1]).astype(jnp.bfloat16)    # [B*S, H] bf16
    dec_bth, attn_bts, final_hidden = decoder_fused(x2d, h0, mem2d, params, T, B, S)
    dec_outs = jnp.transpose(dec_bth, (1, 0, 2))              # [T, B, H] (glue)
    p_attn = jnp.transpose(attn_bts, (1, 0, 2))               # [T, B, S] (glue)
    # dropout(0.3): identity in eval mode
    return dec_outs, p_attn, final_hidden


def init_params(key, vocab, emb_dim, hidden):
    ks = jax.random.split(key, 8)
    s = 0.1
    bf16 = jnp.bfloat16
    nrm = lambda k, shape: (s * jax.random.normal(k, shape)).astype(jnp.float32)
    return {
        "emb_table": nrm(ks[0], (vocab, emb_dim)),
        # fused GRU weights, gate order [r | z | n]; pre-cast bf16 (outside per-call path)
        "wi3": nrm(ks[1], (emb_dim, 3 * hidden)).astype(bf16),   # applied as x @ wi3
        "wh3": nrm(ks[2], (hidden, 3 * hidden)).astype(bf16),    # applied as h @ wh3
        # fused input-side bias [b_ir+b_hr | b_iz+b_hz | b_in]
        "bi3": nrm(ks[3], (1, 3 * hidden)),
        # hidden-side new-gate bias b_hn (stays inside r * (.) term)
        "bhn": nrm(ks[4], (1, hidden)),
        # attention: linear_in W_a; linear_out split into context / state halves
        "wa": nrm(ks[5], (hidden, hidden)).astype(bf16),
        "wc": nrm(ks[6], (hidden, hidden)).astype(bf16),
        "who": nrm(ks[7], (hidden, hidden)).astype(bf16),
    }


if __name__ == "__main__":
    key = jax.random.PRNGKey(0)
    k_par, k_tgt, k_mem, k_h0 = jax.random.split(key, 4)

    VOCAB, EMB, HID = 20, 32, 32
    T, S, B = 8, 10, 2

    params = init_params(k_par, VOCAB, EMB, HID)
    tgt_ids = jax.random.randint(k_tgt, (T, B), 0, VOCAB)             # [T, B] token ids
    memory_bank = (0.1 * jax.random.normal(k_mem, (S, B, HID))).astype(jnp.float32)
    h0 = (0.1 * jax.random.normal(k_h0, (B, HID))).astype(jnp.float32)

    dec_outs, p_attn, final_h = jax.jit(text_decoder_forward)(
        tgt_ids, memory_bank, h0, params)
    jax.block_until_ready((dec_outs, p_attn, final_h))

    assert dec_outs.shape == (T, B, HID)
    assert p_attn.shape == (T, B, S)
    assert final_h.shape == (B, HID)
    assert bool(jnp.all(jnp.isfinite(dec_outs)))
    assert bool(jnp.all(jnp.isfinite(final_h)))
    # exact-softmax alignments must (nearly) sum to 1
    assert bool(jnp.allclose(jnp.sum(p_attn, axis=-1), 1.0, atol=1e-3))
    print("KERNEL_OK")
</pallas_src>

<mosaic_0001>
module attributes {stable_mosaic.version = 11 : i64} {
  func.func @_decoder_kernel(%arg0: i32, %arg1: memref<16x32xbf16, #tpu.memory_space<vmem>>, %arg2: memref<2x32xf32, #tpu.memory_space<vmem>>, %arg3: memref<32x96xbf16, #tpu.memory_space<vmem>>, %arg4: memref<1x96xf32, #tpu.memory_space<vmem>>, %arg5: memref<32x96xbf16, #tpu.memory_space<vmem>>, %arg6: memref<1x32xf32, #tpu.memory_space<vmem>>, %arg7: memref<20x32xbf16, #tpu.memory_space<vmem>>, %arg8: memref<32x32xbf16, #tpu.memory_space<vmem>>, %arg9: memref<32x32xbf16, #tpu.memory_space<vmem>>, %arg10: memref<32x32xbf16, #tpu.memory_space<vmem>>, %arg11: memref<2x8x32xf32, #tpu.memory_space<vmem>>, %arg12: memref<2x8x10xf32, #tpu.memory_space<vmem>>, %arg13: memref<2x32xf32, #tpu.memory_space<vmem>>, %arg14: memref<8x2x32xbf16, #tpu.memory_space<vmem>>) attributes {dimension_semantics = [#tpu.dimension_semantics<arbitrary>], iteration_bounds = array<i64: 1>, scalar_prefetch = 0 : i64, scratch_operands = 1 : i64, tpu.core_type = #tpu.core_type<tc>, window_params = [{pipeline_mode = #tpu.pipeline_mode<synchronous>, transform_indices = @transform_0, window_bounds = array<i64: 16, 32>}, {pipeline_mode = #tpu.pipeline_mode<synchronous>, transform_indices = @transform_1, window_bounds = array<i64: 2, 32>}, {pipeline_mode = #tpu.pipeline_mode<synchronous>, transform_indices = @transform_2, window_bounds = array<i64: 32, 96>}, {pipeline_mode = #tpu.pipeline_mode<synchronous>, transform_indices = @transform_3, window_bounds = array<i64: 1, 96>}, {pipeline_mode = #tpu.pipeline_mode<synchronous>, transform_indices = @transform_4, window_bounds = array<i64: 32, 96>}, {pipeline_mode = #tpu.pipeline_mode<synchronous>, transform_indices = @transform_5, window_bounds = array<i64: 1, 32>}, {pipeline_mode = #tpu.pipeline_mode<synchronous>, transform_indices = @transform_6, window_bounds = array<i64: 20, 32>}, {pipeline_mode = #tpu.pipeline_mode<synchronous>, transform_indices = @transform_7, window_bounds = array<i64: 32, 32>}, {pipeline_mode = #tpu.pipeline_mode<synchronous>, transform_indices = @transform_8, window_bounds = array<i64: 32, 32>}, {pipeline_mode = #tpu.pipeline_mode<synchronous>, transform_indices = @transform_9, window_bounds = array<i64: 32, 32>}, {pipeline_mode = #tpu.pipeline_mode<synchronous>, transform_indices = @transform_10, window_bounds = array<i64: 2, 8, 32>}, {pipeline_mode = #tpu.pipeline_mode<synchronous>, transform_indices = @transform_11, window_bounds = array<i64: 2, 8, 10>}, {pipeline_mode = #tpu.pipeline_mode<synchronous>, transform_indices = @transform_12, window_bounds = array<i64: 2, 32>}]} {
    %c0 = arith.constant 0 : index
    %c0_0 = arith.constant 0 : index
    %0 = vector.load %arg1[%c0, %c0_0] : memref<16x32xbf16, #tpu.memory_space<vmem>>, vector<16x32xbf16>
    %c0_1 = arith.constant 0 : index
    %c0_2 = arith.constant 0 : index
    %1 = vector.load %arg3[%c0_1, %c0_2] : memref<32x96xbf16, #tpu.memory_space<vmem>>, vector<32x96xbf16>
    %cst = arith.constant dense<0.000000e+00> : vector<16x96xf32>
    %2 = tpu.matmul %0, %1, %cst {dimension_numbers = #tpu.dot_dimension_numbers<[1], [0], [0], [1], [0, 0, 1, 1], [], []>} : vector<16x32xbf16>, vector<32x96xbf16>, vector<16x96xf32> -> vector<16x96xf32>
    %c0_3 = arith.constant 0 : index
    %c0_4 = arith.constant 0 : index
    %3 = vector.load %arg4[%c0_3, %c0_4] : memref<1x96xf32, #tpu.memory_space<vmem>>, vector<1x96xf32>
    %4 = vector.broadcast %3 : vector<1x96xf32> to vector<16x96xf32>
    %5 = arith.addf %2, %4 : vector<16x96xf32>
    %c0_5 = arith.constant 0 : index
    %c0_6 = arith.constant 0 : index
    %6 = vector.load %arg7[%c0_5, %c0_6] : memref<20x32xbf16, #tpu.memory_space<vmem>>, vector<20x32xbf16>
    %c0_7 = arith.constant 0 : index
    %c0_8 = arith.constant 0 : index
    %7 = vector.load %arg8[%c0_7, %c0_8] : memref<32x32xbf16, #tpu.memory_space<vmem>>, vector<32x32xbf16>
    %cst_9 = arith.constant dense<0.000000e+00> : vector<20x32xf32>
    %8 = tpu.matmul %6, %7, %cst_9 {dimension_numbers = #tpu.dot_dimension_numbers<[1], [1], [0], [0], [0, 0, 1, 0], [], []>} : vector<20x32xbf16>, vector<32x32xbf16>, vector<20x32xf32> -> vector<20x32xf32>
    %9 = arith.truncf %8 : vector<20x32xf32> to vector<20x32xbf16>
    %c0_10 = arith.constant 0 : index
    %c0_11 = arith.constant 0 : index
    %10 = vector.load %arg9[%c0_10, %c0_11] : memref<32x32xbf16, #tpu.memory_space<vmem>>, vector<32x32xbf16>
    %cst_12 = arith.constant dense<0.000000e+00> : vector<20x32xf32>
    %11 = tpu.matmul %6, %10, %cst_12 {dimension_numbers = #tpu.dot_dimension_numbers<[1], [0], [0], [1], [0, 0, 1, 1], [], []>} : vector<20x32xbf16>, vector<32x32xbf16>, vector<20x32xf32> -> vector<20x32xf32>
    %12 = arith.truncf %11 : vector<20x32xf32> to vector<20x32xbf16>
    %c0_13 = arith.constant 0 : index
    %c0_14 = arith.constant 0 : index
    %13 = vector.load %arg5[%c0_13, %c0_14] : memref<32x96xbf16, #tpu.memory_space<vmem>>, vector<32x96xbf16>
    %c0_15 = arith.constant 0 : index
    %c0_16 = arith.constant 0 : index
    %14 = vector.load %arg6[%c0_15, %c0_16] : memref<1x32xf32, #tpu.memory_space<vmem>>, vector<1x32xf32>
    %c0_17 = arith.constant 0 : index
    %c0_18 = arith.constant 0 : index
    %15 = vector.load %arg2[%c0_17, %c0_18] : memref<2x32xf32, #tpu.memory_space<vmem>>, vector<2x32xf32>
    %16 = arith.truncf %15 : vector<2x32xf32> to vector<2x32xbf16>
    %cst_19 = arith.constant dense<0.000000e+00> : vector<2x96xf32>
    %17 = tpu.matmul %16, %13, %cst_19 {dimension_numbers = #tpu.dot_dimension_numbers<[1], [0], [0], [1], [0, 0, 1, 1], [], []>} : vector<2x32xbf16>, vector<32x96xbf16>, vector<2x96xf32> -> vector<2x96xf32>
    %18 = vector.extract_strided_slice %5 {offsets = [0, 0], sizes = [2, 96], strides = [1, 1]} : vector<16x96xf32> to vector<2x96xf32>
    %19 = vector.extract_strided_slice %18 {offsets = [0, 0], sizes = [2, 32], strides = [1, 1]} : vector<2x96xf32> to vector<2x32xf32>
    %20 = vector.extract_strided_slice %17 {offsets = [0, 0], sizes = [2, 32], strides = [1, 1]} : vector<2x96xf32> to vector<2x32xf32>
    %21 = arith.addf %19, %20 : vector<2x32xf32>
    %22 = arith.negf %21 : vector<2x32xf32>
    %23 = math.exp %22 : vector<2x32xf32>
    %cst_20 = arith.constant 1.000000e+00 : f32
    %24 = vector.broadcast %cst_20 : f32 to vector<2x32xf32>
    %25 = arith.addf %24, %23 : vector<2x32xf32>
    %26 = arith.divf %24, %25 : vector<2x32xf32>
    %27 = vector.extract_strided_slice %18 {offsets = [0, 32], sizes = [2, 32], strides = [1, 1]} : vector<2x96xf32> to vector<2x32xf32>
    %28 = vector.extract_strided_slice %17 {offsets = [0, 32], sizes = [2, 32], strides = [1, 1]} : vector<2x96xf32> to vector<2x32xf32>
    %29 = arith.addf %27, %28 : vector<2x32xf32>
    %30 = arith.negf %29 : vector<2x32xf32>
    %31 = math.exp %30 : vector<2x32xf32>
    %cst_21 = arith.constant 1.000000e+00 : f32
    %32 = vector.broadcast %cst_21 : f32 to vector<2x32xf32>
    %33 = arith.addf %32, %31 : vector<2x32xf32>
    %34 = arith.divf %32, %33 : vector<2x32xf32>
    %35 = vector.extract_strided_slice %18 {offsets = [0, 64], sizes = [2, 32], strides = [1, 1]} : vector<2x96xf32> to vector<2x32xf32>
    %36 = vector.extract_strided_slice %17 {offsets = [0, 64], sizes = [2, 32], strides = [1, 1]} : vector<2x96xf32> to vector<2x32xf32>
    %37 = vector.broadcast %14 : vector<1x32xf32> to vector<2x32xf32>
    %38 = arith.addf %36, %37 : vector<2x32xf32>
    %39 = arith.mulf %26, %38 : vector<2x32xf32>
    %40 = arith.addf %35, %39 : vector<2x32xf32>
    %41 = math.tanh %40 : vector<2x32xf32>
    %cst_22 = arith.constant 1.000000e+00 : f32
    %42 = vector.broadcast %cst_22 : f32 to vector<2x32xf32>
    %43 = arith.subf %42, %34 : vector<2x32xf32>
    %44 = arith.mulf %43, %41 : vector<2x32xf32>
    %45 = arith.mulf %34, %15 : vector<2x32xf32>
    %46 = arith.addf %44, %45 : vector<2x32xf32>
    %47 = arith.truncf %46 : vector<2x32xf32> to vector<2x32xbf16>
    %c0_23 = arith.constant 0 : index
    %c0_24 = arith.constant 0 : index
    %c0_25 = arith.constant 0 : index
    %48 = vector.load %arg14[%c0_23, %c0_24, %c0_25] : memref<8x2x32xbf16, #tpu.memory_space<vmem>>, vector<1x2x32xbf16>
    %49 = vector.shape_cast %48 : vector<1x2x32xbf16> to vector<2x32xbf16>
    %50 = vector.shape_cast %47 : vector<2x32xbf16> to vector<1x2x32xbf16>
    tpu.vector_store %arg14[%c0_23, %c0_24, %c0_25], %50 {strides = array<i32>} : memref<8x2x32xbf16, #tpu.memory_space<vmem>>, vector<1x2x32xbf16>,
    %cst_26 = arith.constant dense<0.000000e+00> : vector<2x96xf32>
    %51 = tpu.matmul %47, %13, %cst_26 {dimension_numbers = #tpu.dot_dimension_numbers<[1], [0], [0], [1], [0, 0, 1, 1], [], []>} : vector<2x32xbf16>, vector<32x96xbf16>, vector<2x96xf32> -> vector<2x96xf32>
    %52 = vector.extract_strided_slice %5 {offsets = [2, 0], sizes = [2, 96], strides = [1, 1]} : vector<16x96xf32> to vector<2x96xf32>
    %53 = vector.extract_strided_slice %52 {offsets = [0, 0], sizes = [2, 32], strides = [1, 1]} : vector<2x96xf32> to vector<2x32xf32>
    %54 = vector.extract_strided_slice %51 {offsets = [0, 0], sizes = [2, 32], strides = [1, 1]} : vector<2x96xf32> to vector<2x32xf32>
    %55 = arith.addf %53, %54 : vector<2x32xf32>
    %56 = arith.negf %55 : vector<2x32xf32>
    %57 = math.exp %56 : vector<2x32xf32>
    %cst_27 = arith.constant 1.000000e+00 : f32
    %58 = vector.broadcast %cst_27 : f32 to vector<2x32xf32>
    %59 = arith.addf %58, %57 : vector<2x32xf32>
    %60 = arith.divf %58, %59 : vector<2x32xf32>
    %61 = vector.extract_strided_slice %52 {offsets = [0, 32], sizes = [2, 32], strides = [1, 1]} : vector<2x96xf32> to vector<2x32xf32>
    %62 = vector.extract_strided_slice %51 {offsets = [0, 32], sizes = [2, 32], strides = [1, 1]} : vector<2x96xf32> to vector<2x32xf32>
    %63 = arith.addf %61, %62 : vector<2x32xf32>
    %64 = arith.negf %63 : vector<2x32xf32>
    %65 = math.exp %64 : vector<2x32xf32>
    %cst_28 = arith.constant 1.000000e+00 : f32
    %66 = vector.broadcast %cst_28 : f32 to vector<2x32xf32>
    %67 = arith.addf %66, %65 : vector<2x32xf32>
    %68 = arith.divf %66, %67 : vector<2x32xf32>
    %69 = vector.extract_strided_slice %52 {offsets = [0, 64], sizes = [2, 32], strides = [1, 1]} : vector<2x96xf32> to vector<2x32xf32>
    %70 = vector.extract_strided_slice %51 {offsets = [0, 64], sizes = [2, 32], strides = [1, 1]} : vector<2x96xf32> to vector<2x32xf32>
    %71 = vector.broadcast %14 : vector<1x32xf32> to vector<2x32xf32>
    %72 = arith.addf %70, %71 : vector<2x32xf32>
    %73 = arith.mulf %60, %72 : vector<2x32xf32>
    %74 = arith.addf %69, %73 : vector<2x32xf32>
    %75 = math.tanh %74 : vector<2x32xf32>
    %cst_29 = arith.constant 1.000000e+00 : f32
    %76 = vector.broadcast %cst_29 : f32 to vector<2x32xf32>
    %77 = arith.subf %76, %68 : vector<2x32xf32>
    %78 = arith.mulf %77, %75 : vector<2x32xf32>
    %79 = arith.mulf %68, %46 : vector<2x32xf32>
    %80 = arith.addf %78, %79 : vector<2x32xf32>
    %81 = arith.truncf %80 : vector<2x32xf32> to vector<2x32xbf16>
    %c1 = arith.constant 1 : index
    %c0_30 = arith.constant 0 : index
    %c0_31 = arith.constant 0 : index
    %82 = vector.load %arg14[%c1, %c0_30, %c0_31] : memref<8x2x32xbf16, #tpu.memory_space<vmem>>, vector<1x2x32xbf16>
    %83 = vector.shape_cast %82 : vector<1x2x32xbf16> to vector<2x32xbf16>
    %84 = vector.shape_cast %81 : vector<2x32xbf16> to vector<1x2x32xbf16>
    tpu.vector_store %arg14[%c1, %c0_30, %c0_31], %84 {strides = array<i32>} : memref<8x2x32xbf16, #tpu.memory_space<vmem>>, vector<1x2x32xbf16>,
    %cst_32 = arith.constant dense<0.000000e+00> : vector<2x96xf32>
    %85 = tpu.matmul %81, %13, %cst_32 {dimension_numbers = #tpu.dot_dimension_numbers<[1], [0], [0], [1], [0, 0, 1, 1], [], []>} : vector<2x32xbf16>, vector<32x96xbf16>, vector<2x96xf32> -> vector<2x96xf32>
    %86 = vector.extract_strided_slice %5 {offsets = [4, 0], sizes = [2, 96], strides = [1, 1]} : vector<16x96xf32> to vector<2x96xf32>
    %87 = vector.extract_strided_slice %86 {offsets = [0, 0], sizes = [2, 32], strides = [1, 1]} : vector<2x96xf32> to vector<2x32xf32>
    %88 = vector.extract_strided_slice %85 {offsets = [0, 0], sizes = [2, 32], strides = [1, 1]} : vector<2x96xf32> to vector<2x32xf32>
    %89 = arith.addf %87, %88 : vector<2x32xf32>
    %90 = arith.negf %89 : vector<2x32xf32>
    %91 = math.exp %90 : vector<2x32xf32>
    %cst_33 = arith.constant 1.000000e+00 : f32
    %92 = vector.broadcast %cst_33 : f32 to vector<2x32xf32>
    %93 = arith.addf %92, %91 : vector<2x32xf32>
    %94 = arith.divf %92, %93 : vector<2x32xf32>
    %95 = vector.extract_strided_slice %86 {offsets = [0, 32], sizes = [2, 32], strides = [1, 1]} : vector<2x96xf32> to vector<2x32xf32>
    %96 = vector.extract_strided_slice %85 {offsets = [0, 32], sizes = [2, 32], strides = [1, 1]} : vector<2x96xf32> to vector<2x32xf32>
    %97 = arith.addf %95, %96 : vector<2x32xf32>
    %98 = arith.negf %97 : vector<2x32xf32>
    %99 = math.exp %98 : vector<2x32xf32>
    %cst_34 = arith.constant 1.000000e+00 : f32
    %100 = vector.broadcast %cst_34 : f32 to vector<2x32xf32>
    %101 = arith.addf %100, %99 : vector<2x32xf32>
    %102 = arith.divf %100, %101 : vector<2x32xf32>
    %103 = vector.extract_strided_slice %86 {offsets = [0, 64], sizes = [2, 32], strides = [1, 1]} : vector<2x96xf32> to vector<2x32xf32>
    %104 = vector.extract_strided_slice %85 {offsets = [0, 64], sizes = [2, 32], strides = [1, 1]} : vector<2x96xf32> to vector<2x32xf32>
    %105 = vector.broadcast %14 : vector<1x32xf32> to vector<2x32xf32>
    %106 = arith.addf %104, %105 : vector<2x32xf32>
    %107 = arith.mulf %94, %106 : vector<2x32xf32>
    %108 = arith.addf %103, %107 : vector<2x32xf32>
    %109 = math.tanh %108 : vector<2x32xf32>
    %cst_35 = arith.constant 1.000000e+00 : f32
    %110 = vector.broadcast %cst_35 : f32 to vector<2x32xf32>
    %111 = arith.subf %110, %102 : vector<2x32xf32>
    %112 = arith.mulf %111, %109 : vector<2x32xf32>
    %113 = arith.mulf %102, %80 : vector<2x32xf32>
    %114 = arith.addf %112, %113 : vector<2x32xf32>
    %115 = arith.truncf %114 : vector<2x32xf32> to vector<2x32xbf16>
    %c2 = arith.constant 2 : index
    %c0_36 = arith.constant 0 : index
    %c0_37 = arith.constant 0 : index
    %116 = vector.load %arg14[%c2, %c0_36, %c0_37] : memref<8x2x32xbf16, #tpu.memory_space<vmem>>, vector<1x2x32xbf16>
    %117 = vector.shape_cast %116 : vector<1x2x32xbf16> to vector<2x32xbf16>
    %118 = vector.shape_cast %115 : vector<2x32xbf16> to vector<1x2x32xbf16>
    tpu.vector_store %arg14[%c2, %c0_36, %c0_37], %118 {strides = array<i32>} : memref<8x2x32xbf16, #tpu.memory_space<vmem>>, vector<1x2x32xbf16>,
    %cst_38 = arith.constant dense<0.000000e+00> : vector<2x96xf32>
    %119 = tpu.matmul %115, %13, %cst_38 {dimension_numbers = #tpu.dot_dimension_numbers<[1], [0], [0], [1], [0, 0, 1, 1], [], []>} : vector<2x32xbf16>, vector<32x96xbf16>, vector<2x96xf32> -> vector<2x96xf32>
    %120 = vector.extract_strided_slice %5 {offsets = [6, 0], sizes = [2, 96], strides = [1, 1]} : vector<16x96xf32> to vector<2x96xf32>
    %121 = vector.extract_strided_slice %120 {offsets = [0, 0], sizes = [2, 32], strides = [1, 1]} : vector<2x96xf32> to vector<2x32xf32>
    %122 = vector.extract_strided_slice %119 {offsets = [0, 0], sizes = [2, 32], strides = [1, 1]} : vector<2x96xf32> to vector<2x32xf32>
    %123 = arith.addf %121, %122 : vector<2x32xf32>
    %124 = arith.negf %123 : vector<2x32xf32>
    %125 = math.exp %124 : vector<2x32xf32>
    %cst_39 = arith.constant 1.000000e+00 : f32
    %126 = vector.broadcast %cst_39 : f32 to vector<2x32xf32>
    %127 = arith.addf %126, %125 : vector<2x32xf32>
    %128 = arith.divf %126, %127 : vector<2x32xf32>
    %129 = vector.extract_strided_slice %120 {offsets = [0, 32], sizes = [2, 32], strides = [1, 1]} : vector<2x96xf32> to vector<2x32xf32>
    %130 = vector.extract_strided_slice %119 {offsets = [0, 32], sizes = [2, 32], strides = [1, 1]} : vector<2x96xf32> to vector<2x32xf32>
    %131 = arith.addf %129, %130 : vector<2x32xf32>
    %132 = arith.negf %131 : vector<2x32xf32>
    %133 = math.exp %132 : vector<2x32xf32>
    %cst_40 = arith.constant 1.000000e+00 : f32
    %134 = vector.broadcast %cst_40 : f32 to vector<2x32xf32>
    %135 = arith.addf %134, %133 : vector<2x32xf32>
    %136 = arith.divf %134, %135 : vector<2x32xf32>
    %137 = vector.extract_strided_slice %120 {offsets = [0, 64], sizes = [2, 32], strides = [1, 1]} : vector<2x96xf32> to vector<2x32xf32>
    %138 = vector.extract_strided_slice %119 {offsets = [0, 64], sizes = [2, 32], strides = [1, 1]} : vector<2x96xf32> to vector<2x32xf32>
    %139 = vector.broadcast %14 : vector<1x32xf32> to vector<2x32xf32>
    %140 = arith.addf %138, %139 : vector<2x32xf32>
    %141 = arith.mulf %128, %140 : vector<2x32xf32>
    %142 = arith.addf %137, %141 : vector<2x32xf32>
    %143 = math.tanh %142 : vector<2x32xf32>
    %cst_41 = arith.constant 1.000000e+00 : f32
    %144 = vector.broadcast %cst_41 : f32 to vector<2x32xf32>
    %145 = arith.subf %144, %136 : vector<2x32xf32>
    %146 = arith.mulf %145, %143 : vector<2x32xf32>
    %147 = arith.mulf %136, %114 : vector<2x32xf32>
    %148 = arith.addf %146, %147 : vector<2x32xf32>
    %149 = arith.truncf %148 : vector<2x32xf32> to vector<2x32xbf16>
    %c3 = arith.constant 3 : index
    %c0_42 = arith.constant 0 : index
    %c0_43 = arith.constant 0 : index
    %150 = vector.load %arg14[%c3, %c0_42, %c0_43] : memref<8x2x32xbf16, #tpu.memory_space<vmem>>, vector<1x2x32xbf16>
    %151 = vector.shape_cast %150 : vector<1x2x32xbf16> to vector<2x32xbf16>
    %152 = vector.shape_cast %149 : vector<2x32xbf16> to vector<1x2x32xbf16>
    tpu.vector_store %arg14[%c3, %c0_42, %c0_43], %152 {strides = array<i32>} : memref<8x2x32xbf16, #tpu.memory_space<vmem>>, vector<1x2x32xbf16>,
    %cst_44 = arith.constant dense<0.000000e+00> : vector<2x96xf32>
    %153 = tpu.matmul %149, %13, %cst_44 {dimension_numbers = #tpu.dot_dimension_numbers<[1], [0], [0], [1], [0, 0, 1, 1], [], []>} : vector<2x32xbf16>, vector<32x96xbf16>, vector<2x96xf32> -> vector<2x96xf32>
    %154 = vector.extract_strided_slice %5 {offsets = [8, 0], sizes = [2, 96], strides = [1, 1]} : vector<16x96xf32> to vector<2x96xf32>
    %155 = vector.extract_strided_slice %154 {offsets = [0, 0], sizes = [2, 32], strides = [1, 1]} : vector<2x96xf32> to vector<2x32xf32>
    %156 = vector.extract_strided_slice %153 {offsets = [0, 0], sizes = [2, 32], strides = [1, 1]} : vector<2x96xf32> to vector<2x32xf32>
    %157 = arith.addf %155, %156 : vector<2x32xf32>
    %158 = arith.negf %157 : vector<2x32xf32>
    %159 = math.exp %158 : vector<2x32xf32>
    %cst_45 = arith.constant 1.000000e+00 : f32
    %160 = vector.broadcast %cst_45 : f32 to vector<2x32xf32>
    %161 = arith.addf %160, %159 : vector<2x32xf32>
    %162 = arith.divf %160, %161 : vector<2x32xf32>
    %163 = vector.extract_strided_slice %154 {offsets = [0, 32], sizes = [2, 32], strides = [1, 1]} : vector<2x96xf32> to vector<2x32xf32>
    %164 = vector.extract_strided_slice %153 {offsets = [0, 32], sizes = [2, 32], strides = [1, 1]} : vector<2x96xf32> to vector<2x32xf32>
    %165 = arith.addf %163, %164 : vector<2x32xf32>
    %166 = arith.negf %165 : vector<2x32xf32>
    %167 = math.exp %166 : vector<2x32xf32>
    %cst_46 = arith.constant 1.000000e+00 : f32
    %168 = vector.broadcast %cst_46 : f32 to vector<2x32xf32>
    %169 = arith.addf %168, %167 : vector<2x32xf32>
    %170 = arith.divf %168, %169 : vector<2x32xf32>
    %171 = vector.extract_strided_slice %154 {offsets = [0, 64], sizes = [2, 32], strides = [1, 1]} : vector<2x96xf32> to vector<2x32xf32>
    %172 = vector.extract_strided_slice %153 {offsets = [0, 64], sizes = [2, 32], strides = [1, 1]} : vector<2x96xf32> to vector<2x32xf32>
    %173 = vector.broadcast %14 : vector<1x32xf32> to vector<2x32xf32>
    %174 = arith.addf %172, %173 : vector<2x32xf32>
    %175 = arith.mulf %162, %174 : vector<2x32xf32>
    %176 = arith.addf %171, %175 : vector<2x32xf32>
    %177 = math.tanh %176 : vector<2x32xf32>
    %cst_47 = arith.constant 1.000000e+00 : f32
    %178 = vector.broadcast %cst_47 : f32 to vector<2x32xf32>
    %179 = arith.subf %178, %170 : vector<2x32xf32>
    %180 = arith.mulf %179, %177 : vector<2x32xf32>
    %181 = arith.mulf %170, %148 : vector<2x32xf32>
    %182 = arith.addf %180, %181 : vector<2x32xf32>
    %183 = arith.truncf %182 : vector<2x32xf32> to vector<2x32xbf16>
    %c4 = arith.constant 4 : index
    %c0_48 = arith.constant 0 : index
    %c0_49 = arith.constant 0 : index
    %184 = vector.load %arg14[%c4, %c0_48, %c0_49] : memref<8x2x32xbf16, #tpu.memory_space<vmem>>, vector<1x2x32xbf16>
    %185 = vector.shape_cast %184 : vector<1x2x32xbf16> to vector<2x32xbf16>
    %186 = vector.shape_cast %183 : vector<2x32xbf16> to vector<1x2x32xbf16>
    tpu.vector_store %arg14[%c4, %c0_48, %c0_49], %186 {strides = array<i32>} : memref<8x2x32xbf16, #tpu.memory_space<vmem>>, vector<1x2x32xbf16>,
    %cst_50 = arith.constant dense<0.000000e+00> : vector<2x96xf32>
    %187 = tpu.matmul %183, %13, %cst_50 {dimension_numbers = #tpu.dot_dimension_numbers<[1], [0], [0], [1], [0, 0, 1, 1], [], []>} : vector<2x32xbf16>, vector<32x96xbf16>, vector<2x96xf32> -> vector<2x96xf32>
    %188 = vector.extract_strided_slice %5 {offsets = [10, 0], sizes = [2, 96], strides = [1, 1]} : vector<16x96xf32> to vector<2x96xf32>
    %189 = vector.extract_strided_slice %188 {offsets = [0, 0], sizes = [2, 32], strides = [1, 1]} : vector<2x96xf32> to vector<2x32xf32>
    %190 = vector.extract_strided_slice %187 {offsets = [0, 0], sizes = [2, 32], strides = [1, 1]} : vector<2x96xf32> to vector<2x32xf32>
    %191 = arith.addf %189, %190 : vector<2x32xf32>
    %192 = arith.negf %191 : vector<2x32xf32>
    %193 = math.exp %192 : vector<2x32xf32>
    %cst_51 = arith.constant 1.000000e+00 : f32
    %194 = vector.broadcast %cst_51 : f32 to vector<2x32xf32>
    %195 = arith.addf %194, %193 : vector<2x32xf32>
    %196 = arith.divf %194, %195 : vector<2x32xf32>
    %197 = vector.extract_strided_slice %188 {offsets = [0, 32], sizes = [2, 32], strides = [1, 1]} : vector<2x96xf32> to vector<2x32xf32>
    %198 = vector.extract_strided_slice %187 {offsets = [0, 32], sizes = [2, 32], strides = [1, 1]} : vector<2x96xf32> to vector<2x32xf32>
    %199 = arith.addf %197, %198 : vector<2x32xf32>
    %200 = arith.negf %199 : vector<2x32xf32>
    %201 = math.exp %200 : vector<2x32xf32>
    %cst_52 = arith.constant 1.000000e+00 : f32
    %202 = vector.broadcast %cst_52 : f32 to vector<2x32xf32>
    %203 = arith.addf %202, %201 : vector<2x32xf32>
    %204 = arith.divf %202, %203 : vector<2x32xf32>
    %205 = vector.extract_strided_slice %188 {offsets = [0, 64], sizes = [2, 32], strides = [1, 1]} : vector<2x96xf32> to vector<2x32xf32>
    %206 = vector.extract_strided_slice %187 {offsets = [0, 64], sizes = [2, 32], strides = [1, 1]} : vector<2x96xf32> to vector<2x32xf32>
    %207 = vector.broadcast %14 : vector<1x32xf32> to vector<2x32xf32>
    %208 = arith.addf %206, %207 : vector<2x32xf32>
    %209 = arith.mulf %196, %208 : vector<2x32xf32>
    %210 = arith.addf %205, %209 : vector<2x32xf32>
    %211 = math.tanh %210 : vector<2x32xf32>
    %cst_53 = arith.constant 1.000000e+00 : f32
    %212 = vector.broadcast %cst_53 : f32 to vector<2x32xf32>
    %213 = arith.subf %212, %204 : vector<2x32xf32>
    %214 = arith.mulf %213, %211 : vector<2x32xf32>
    %215 = arith.mulf %204, %182 : vector<2x32xf32>
    %216 = arith.addf %214, %215 : vector<2x32xf32>
    %217 = arith.truncf %216 : vector<2x32xf32> to vector<2x32xbf16>
    %c5 = arith.constant 5 : index
    %c0_54 = arith.constant 0 : index
    %c0_55 = arith.constant 0 : index
    %218 = vector.load %arg14[%c5, %c0_54, %c0_55] : memref<8x2x32xbf16, #tpu.memory_space<vmem>>, vector<1x2x32xbf16>
    %219 = vector.shape_cast %218 : vector<1x2x32xbf16> to vector<2x32xbf16>
    %220 = vector.shape_cast %217 : vector<2x32xbf16> to vector<1x2x32xbf16>
    tpu.vector_store %arg14[%c5, %c0_54, %c0_55], %220 {strides = array<i32>} : memref<8x2x32xbf16, #tpu.memory_space<vmem>>, vector<1x2x32xbf16>,
    %cst_56 = arith.constant dense<0.000000e+00> : vector<2x96xf32>
    %221 = tpu.matmul %217, %13, %cst_56 {dimension_numbers = #tpu.dot_dimension_numbers<[1], [0], [0], [1], [0, 0, 1, 1], [], []>} : vector<2x32xbf16>, vector<32x96xbf16>, vector<2x96xf32> -> vector<2x96xf32>
    %222 = vector.extract_strided_slice %5 {offsets = [12, 0], sizes = [2, 96], strides = [1, 1]} : vector<16x96xf32> to vector<2x96xf32>
    %223 = vector.extract_strided_slice %222 {offsets = [0, 0], sizes = [2, 32], strides = [1, 1]} : vector<2x96xf32> to vector<2x32xf32>
    %224 = vector.extract_strided_slice %221 {offsets = [0, 0], sizes = [2, 32], strides = [1, 1]} : vector<2x96xf32> to vector<2x32xf32>
    %225 = arith.addf %223, %224 : vector<2x32xf32>
    %226 = arith.negf %225 : vector<2x32xf32>
    %227 = math.exp %226 : vector<2x32xf32>
    %cst_57 = arith.constant 1.000000e+00 : f32
    %228 = vector.broadcast %cst_57 : f32 to vector<2x32xf32>
    %229 = arith.addf %228, %227 : vector<2x32xf32>
    %230 = arith.divf %228, %229 : vector<2x32xf32>
    %231 = vector.extract_strided_slice %222 {offsets = [0, 32], sizes = [2, 32], strides = [1, 1]} : vector<2x96xf32> to vector<2x32xf32>
    %232 = vector.extract_strided_slice %221 {offsets = [0, 32], sizes = [2, 32], strides = [1, 1]} : vector<2x96xf32> to vector<2x32xf32>
    %233 = arith.addf %231, %232 : vector<2x32xf32>
    %234 = arith.negf %233 : vector<2x32xf32>
    %235 = math.exp %234 : vector<2x32xf32>
    %cst_58 = arith.constant 1.000000e+00 : f32
    %236 = vector.broadcast %cst_58 : f32 to vector<2x32xf32>
    %237 = arith.addf %236, %235 : vector<2x32xf32>
    %238 = arith.divf %236, %237 : vector<2x32xf32>
    %239 = vector.extract_strided_slice %222 {offsets = [0, 64], sizes = [2, 32], strides = [1, 1]} : vector<2x96xf32> to vector<2x32xf32>
    %240 = vector.extract_strided_slice %221 {offsets = [0, 64], sizes = [2, 32], strides = [1, 1]} : vector<2x96xf32> to vector<2x32xf32>
    %241 = vector.broadcast %14 : vector<1x32xf32> to vector<2x32xf32>
    %242 = arith.addf %240, %241 : vector<2x32xf32>
    %243 = arith.mulf %230, %242 : vector<2x32xf32>
    %244 = arith.addf %239, %243 : vector<2x32xf32>
    %245 = math.tanh %244 : vector<2x32xf32>
    %cst_59 = arith.constant 1.000000e+00 : f32
    %246 = vector.broadcast %cst_59 : f32 to vector<2x32xf32>
    %247 = arith.subf %246, %238 : vector<2x32xf32>
    %248 = arith.mulf %247, %245 : vector<2x32xf32>
    %249 = arith.mulf %238, %216 : vector<2x32xf32>
    %250 = arith.addf %248, %249 : vector<2x32xf32>
    %251 = arith.truncf %250 : vector<2x32xf32> to vector<2x32xbf16>
    %c6 = arith.constant 6 : index
    %c0_60 = arith.constant 0 : index
    %c0_61 = arith.constant 0 : index
    %252 = vector.load %arg14[%c6, %c0_60, %c0_61] : memref<8x2x32xbf16, #tpu.memory_space<vmem>>, vector<1x2x32xbf16>
    %253 = vector.shape_cast %252 : vector<1x2x32xbf16> to vector<2x32xbf16>
    %254 = vector.shape_cast %251 : vector<2x32xbf16> to vector<1x2x32xbf16>
    tpu.vector_store %arg14[%c6, %c0_60, %c0_61], %254 {strides = array<i32>} : memref<8x2x32xbf16, #tpu.memory_space<vmem>>, vector<1x2x32xbf16>,
    %cst_62 = arith.constant dense<0.000000e+00> : vector<2x96xf32>
    %255 = tpu.matmul %251, %13, %cst_62 {dimension_numbers = #tpu.dot_dimension_numbers<[1], [0], [0], [1], [0, 0, 1, 1], [], []>} : vector<2x32xbf16>, vector<32x96xbf16>, vector<2x96xf32> -> vector<2x96xf32>
    %256 = vector.extract_strided_slice %5 {offsets = [14, 0], sizes = [2, 96], strides = [1, 1]} : vector<16x96xf32> to vector<2x96xf32>
    %257 = vector.extract_strided_slice %256 {offsets = [0, 0], sizes = [2, 32], strides = [1, 1]} : vector<2x96xf32> to vector<2x32xf32>
    %258 = vector.extract_strided_slice %255 {offsets = [0, 0], sizes = [2, 32], strides = [1, 1]} : vector<2x96xf32> to vector<2x32xf32>
    %259 = arith.addf %257, %258 : vector<2x32xf32>
    %260 = arith.negf %259 : vector<2x32xf32>
    %261 = math.exp %260 : vector<2x32xf32>
    %cst_63 = arith.constant 1.000000e+00 : f32
    %262 = vector.broadcast %cst_63 : f32 to vector<2x32xf32>
    %263 = arith.addf %262, %261 : vector<2x32xf32>
    %264 = arith.divf %262, %263 : vector<2x32xf32>
    %265 = vector.extract_strided_slice %256 {offsets = [0, 32], sizes = [2, 32], strides = [1, 1]} : vector<2x96xf32> to vector<2x32xf32>
    %266 = vector.extract_strided_slice %255 {offsets = [0, 32], sizes = [2, 32], strides = [1, 1]} : vector<2x96xf32> to vector<2x32xf32>
    %267 = arith.addf %265, %266 : vector<2x32xf32>
    %268 = arith.negf %267 : vector<2x32xf32>
    %269 = math.exp %268 : vector<2x32xf32>
    %cst_64 = arith.constant 1.000000e+00 : f32
    %270 = vector.broadcast %cst_64 : f32 to vector<2x32xf32>
    %271 = arith.addf %270, %269 : vector<2x32xf32>
    %272 = arith.divf %270, %271 : vector<2x32xf32>
    %273 = vector.extract_strided_slice %256 {offsets = [0, 64], sizes = [2, 32], strides = [1, 1]} : vector<2x96xf32> to vector<2x32xf32>
    %274 = vector.extract_strided_slice %255 {offsets = [0, 64], sizes = [2, 32], strides = [1, 1]} : vector<2x96xf32> to vector<2x32xf32>
    %275 = vector.broadcast %14 : vector<1x32xf32> to vector<2x32xf32>
    %276 = arith.addf %274, %275 : vector<2x32xf32>
    %277 = arith.mulf %264, %276 : vector<2x32xf32>
    %278 = arith.addf %273, %277 : vector<2x32xf32>
    %279 = math.tanh %278 : vector<2x32xf32>
    %cst_65 = arith.constant 1.000000e+00 : f32
    %280 = vector.broadcast %cst_65 : f32 to vector<2x32xf32>
    %281 = arith.subf %280, %272 : vector<2x32xf32>
    %282 = arith.mulf %281, %279 : vector<2x32xf32>
    %283 = arith.mulf %272, %250 : vector<2x32xf32>
    %284 = arith.addf %282, %283 : vector<2x32xf32>
    %285 = arith.truncf %284 : vector<2x32xf32> to vector<2x32xbf16>
    %c7 = arith.constant 7 : index
    %c0_66 = arith.constant 0 : index
    %c0_67 = arith.constant 0 : index
    %286 = vector.load %arg14[%c7, %c0_66, %c0_67] : memref<8x2x32xbf16, #tpu.memory_space<vmem>>, vector<1x2x32xbf16>
    %287 = vector.shape_cast %286 : vector<1x2x32xbf16> to vector<2x32xbf16>
    %288 = vector.shape_cast %285 : vector<2x32xbf16> to vector<1x2x32xbf16>
    tpu.vector_store %arg14[%c7, %c0_66, %c0_67], %288 {strides = array<i32>} : memref<8x2x32xbf16, #tpu.memory_space<vmem>>, vector<1x2x32xbf16>,
    %c0_68 = arith.constant 0 : index
    %c0_69 = arith.constant 0 : index
    %289 = vector.load %arg13[%c0_68, %c0_69] : memref<2x32xf32, #tpu.memory_space<vmem>>, vector<2x32xf32>
    tpu.vector_store %arg13[%c0_68, %c0_69], %284 {strides = array<i32>} : memref<2x32xf32, #tpu.memory_space<vmem>>, vector<2x32xf32>,
    %c0_70 = arith.constant 0 : index
    %c0_71 = arith.constant 0 : index
    %c0_72 = arith.constant 0 : index
    %290 = vector.load %arg14[%c0_70, %c0_71, %c0_72] : memref<8x2x32xbf16, #tpu.memory_space<vmem>>, vector<8x2x32xbf16>
    %c0_73 = arith.constant 0 : index
    %c0_74 = arith.constant 0 : index
    %291 = vector.load %arg10[%c0_73, %c0_74] : memref<32x32xbf16, #tpu.memory_space<vmem>>, vector<32x32xbf16>
    %292 = vector.extract_strided_slice %290 {offsets = [0, 0, 0], sizes = [8, 1, 32], strides = [1, 1, 1]} : vector<8x2x32xbf16> to vector<8x1x32xbf16>
    %293 = vector.shape_cast %292 : vector<8x1x32xbf16> to vector<8x32xbf16>
    %294 = vector.extract_strided_slice %9 {offsets = [0, 0], sizes = [10, 32], strides = [1, 1]} : vector<20x32xbf16> to vector<10x32xbf16>
    %295 = vector.extract_strided_slice %12 {offsets = [0, 0], sizes = [10, 32], strides = [1, 1]} : vector<20x32xbf16> to vector<10x32xbf16>
    %cst_75 = arith.constant dense<0.000000e+00> : vector<8x10xf32>
    %296 = tpu.matmul %293, %294, %cst_75 {dimension_numbers = #tpu.dot_dimension_numbers<[1], [1], [0], [0], [0, 0, 1, 0], [], []>} : vector<8x32xbf16>, vector<10x32xbf16>, vector<8x10xf32> -> vector<8x10xf32>
    %cst_76 = arith.constant dense<0xFF800000> : vector<8xf32>
    %297 = vector.multi_reduction <maximumf>, %296, %cst_76 [1] : vector<8x10xf32> to vector<8xf32>
    %298 = vector.shape_cast %297 : vector<8xf32> to vector<8x1xf32>
    %299 = vector.broadcast %298 : vector<8x1xf32> to vector<8x10xf32>
    %300 = arith.subf %296, %299 : vector<8x10xf32>
    %301 = math.exp %300 : vector<8x10xf32>
    %cst_77 = arith.constant dense<0.000000e+00> : vector<8xf32>
    %302 = vector.multi_reduction <add>, %301, %cst_77 [1] : vector<8x10xf32> to vector<8xf32>
    %303 = vector.shape_cast %302 : vector<8xf32> to vector<8x1xf32>
    %304 = vector.broadcast %303 : vector<8x1xf32> to vector<8x10xf32>
    %305 = arith.divf %301, %304 : vector<8x10xf32>
    %306 = arith.truncf %305 : vector<8x10xf32> to vector<8x10xbf16>
    %cst_78 = arith.constant dense<0.000000e+00> : vector<8x32xf32>
    %307 = tpu.matmul %306, %295, %cst_78 {dimension_numbers = #tpu.dot_dimension_numbers<[1], [0], [0], [1], [0, 0, 1, 1], [], []>} : vector<8x10xbf16>, vector<10x32xbf16>, vector<8x32xf32> -> vector<8x32xf32>
    %cst_79 = arith.constant dense<0.000000e+00> : vector<8x32xf32>
    %308 = tpu.matmul %293, %291, %cst_79 {dimension_numbers = #tpu.dot_dimension_numbers<[1], [0], [0], [1], [0, 0, 1, 1], [], []>} : vector<8x32xbf16>, vector<32x32xbf16>, vector<8x32xf32> -> vector<8x32xf32>
    %309 = arith.addf %307, %308 : vector<8x32xf32>
    %310 = math.tanh %309 : vector<8x32xf32>
    %c0_80 = arith.constant 0 : index
    %c0_81 = arith.constant 0 : index
    %c0_82 = arith.constant 0 : index
    %311 = vector.load %arg11[%c0_80, %c0_81, %c0_82] : memref<2x8x32xf32, #tpu.memory_space<vmem>>, vector<1x8x32xf32>
    %312 = vector.shape_cast %311 : vector<1x8x32xf32> to vector<8x32xf32>
    %313 = vector.shape_cast %310 : vector<8x32xf32> to vector<1x8x32xf32>
    tpu.vector_store %arg11[%c0_80, %c0_81, %c0_82], %313 {strides = array<i32>} : memref<2x8x32xf32, #tpu.memory_space<vmem>>, vector<1x8x32xf32>,
    %c0_83 = arith.constant 0 : index
    %c0_84 = arith.constant 0 : index
    %c0_85 = arith.constant 0 : index
    %314 = vector.load %arg12[%c0_83, %c0_84, %c0_85] : memref<2x8x10xf32, #tpu.memory_space<vmem>>, vector<1x8x10xf32>
    %315 = vector.shape_cast %314 : vector<1x8x10xf32> to vector<8x10xf32>
    %316 = vector.shape_cast %305 : vector<8x10xf32> to vector<1x8x10xf32>
    tpu.vector_store %arg12[%c0_83, %c0_84, %c0_85], %316 {strides = array<i32>} : memref<2x8x10xf32, #tpu.memory_space<vmem>>, vector<1x8x10xf32>,
    %317 = vector.extract_strided_slice %290 {offsets = [0, 1, 0], sizes = [8, 1, 32], strides = [1, 1, 1]} : vector<8x2x32xbf16> to vector<8x1x32xbf16>
    %318 = vector.shape_cast %317 : vector<8x1x32xbf16> to vector<8x32xbf16>
    %319 = vector.extract_strided_slice %9 {offsets = [10, 0], sizes = [10, 32], strides = [1, 1]} : vector<20x32xbf16> to vector<10x32xbf16>
    %320 = vector.extract_strided_slice %12 {offsets = [10, 0], sizes = [10, 32], strides = [1, 1]} : vector<20x32xbf16> to vector<10x32xbf16>
    %cst_86 = arith.constant dense<0.000000e+00> : vector<8x10xf32>
    %321 = tpu.matmul %318, %319, %cst_86 {dimension_numbers = #tpu.dot_dimension_numbers<[1], [1], [0], [0], [0, 0, 1, 0], [], []>} : vector<8x32xbf16>, vector<10x32xbf16>, vector<8x10xf32> -> vector<8x10xf32>
    %cst_87 = arith.constant dense<0xFF800000> : vector<8xf32>
    %322 = vector.multi_reduction <maximumf>, %321, %cst_87 [1] : vector<8x10xf32> to vector<8xf32>
    %323 = vector.shape_cast %322 : vector<8xf32> to vector<8x1xf32>
    %324 = vector.broadcast %323 : vector<8x1xf32> to vector<8x10xf32>
    %325 = arith.subf %321, %324 : vector<8x10xf32>
    %326 = math.exp %325 : vector<8x10xf32>
    %cst_88 = arith.constant dense<0.000000e+00> : vector<8xf32>
    %327 = vector.multi_reduction <add>, %326, %cst_88 [1] : vector<8x10xf32> to vector<8xf32>
    %328 = vector.shape_cast %327 : vector<8xf32> to vector<8x1xf32>
    %329 = vector.broadcast %328 : vector<8x1xf32> to vector<8x10xf32>
    %330 = arith.divf %326, %329 : vector<8x10xf32>
    %331 = arith.truncf %330 : vector<8x10xf32> to vector<8x10xbf16>
    %cst_89 = arith.constant dense<0.000000e+00> : vector<8x32xf32>
    %332 = tpu.matmul %331, %320, %cst_89 {dimension_numbers = #tpu.dot_dimension_numbers<[1], [0], [0], [1], [0, 0, 1, 1], [], []>} : vector<8x10xbf16>, vector<10x32xbf16>, vector<8x32xf32> -> vector<8x32xf32>
    %cst_90 = arith.constant dense<0.000000e+00> : vector<8x32xf32>
    %333 = tpu.matmul %318, %291, %cst_90 {dimension_numbers = #tpu.dot_dimension_numbers<[1], [0], [0], [1], [0, 0, 1, 1], [], []>} : vector<8x32xbf16>, vector<32x32xbf16>, vector<8x32xf32> -> vector<8x32xf32>
    %334 = arith.addf %332, %333 : vector<8x32xf32>
    %335 = math.tanh %334 : vector<8x32xf32>
    %c1_91 = arith.constant 1 : index
    %c0_92 = arith.constant 0 : index
    %c0_93 = arith.constant 0 : index
    %336 = vector.load %arg11[%c1_91, %c0_92, %c0_93] : memref<2x8x32xf32, #tpu.memory_space<vmem>>, vector<1x8x32xf32>
    %337 = vector.shape_cast %336 : vector<1x8x32xf32> to vector<8x32xf32>
    %338 = vector.shape_cast %335 : vector<8x32xf32> to vector<1x8x32xf32>
    tpu.vector_store %arg11[%c1_91, %c0_92, %c0_93], %338 {strides = array<i32>} : memref<2x8x32xf32, #tpu.memory_space<vmem>>, vector<1x8x32xf32>,
    %c1_94 = arith.constant 1 : index
    %c0_95 = arith.constant 0 : index
    %c0_96 = arith.constant 0 : index
    %339 = vector.load %arg12[%c1_94, %c0_95, %c0_96] : memref<2x8x10xf32, #tpu.memory_space<vmem>>, vector<1x8x10xf32>
    %340 = vector.shape_cast %339 : vector<1x8x10xf32> to vector<8x10xf32>
    %341 = vector.shape_cast %330 : vector<8x10xf32> to vector<1x8x10xf32>
    tpu.vector_store %arg12[%c1_94, %c0_95, %c0_96], %341 {strides = array<i32>} : memref<2x8x10xf32, #tpu.memory_space<vmem>>, vector<1x8x10xf32>,
    return
  }
  func.func @transform_0(%arg0: i32) -> (i32, i32) {
    %c0_i32 = arith.constant 0 : i32
    %c0_i32_0 = arith.constant 0 : i32
    %c0_i32_1 = arith.constant 0 : i32
    return %c0_i32, %c0_i32_0 : i32, i32
  }
  func.func @transform_1(%arg0: i32) -> (i32, i32) {
    %c0_i32 = arith.constant 0 : i32
    %c0_i32_0 = arith.constant 0 : i32
    %c0_i32_1 = arith.constant 0 : i32
    return %c0_i32, %c0_i32_0 : i32, i32
  }
  func.func @transform_2(%arg0: i32) -> (i32, i32) {
    %c0_i32 = arith.constant 0 : i32
    %c0_i32_0 = arith.constant 0 : i32
    %c0_i32_1 = arith.constant 0 : i32
    return %c0_i32, %c0_i32_0 : i32, i32
  }
  func.func @transform_3(%arg0: i32) -> (i32, i32) {
    %c0_i32 = arith.constant 0 : i32
    %c0_i32_0 = arith.constant 0 : i32
    %c0_i32_1 = arith.constant 0 : i32
    return %c0_i32, %c0_i32_0 : i32, i32
  }
  func.func @transform_4(%arg0: i32) -> (i32, i32) {
    %c0_i32 = arith.constant 0 : i32
    %c0_i32_0 = arith.constant 0 : i32
    %c0_i32_1 = arith.constant 0 : i32
    return %c0_i32, %c0_i32_0 : i32, i32
  }
  func.func @transform_5(%arg0: i32) -> (i32, i32) {
    %c0_i32 = arith.constant 0 : i32
    %c0_i32_0 = arith.constant 0 : i32
    %c0_i32_1 = arith.constant 0 : i32
    return %c0_i32, %c0_i32_0 : i32, i32
  }
  func.func @transform_6(%arg0: i32) -> (i32, i32) {
    %c0_i32 = arith.constant 0 : i32
    %c0_i32_0 = arith.constant 0 : i32
    %c0_i32_1 = arith.constant 0 : i32
    return %c0_i32, %c0_i32_0 : i32, i32
  }
  func.func @transform_7(%arg0: i32) -> (i32, i32) {
    %c0_i32 = arith.constant 0 : i32
    %c0_i32_0 = arith.constant 0 : i32
    %c0_i32_1 = arith.constant 0 : i32
    return %c0_i32, %c0_i32_0 : i32, i32
  }
  func.func @transform_8(%arg0: i32) -> (i32, i32) {
    %c0_i32 = arith.constant 0 : i32
    %c0_i32_0 = arith.constant 0 : i32
    %c0_i32_1 = arith.constant 0 : i32
    return %c0_i32, %c0_i32_0 : i32, i32
  }
  func.func @transform_9(%arg0: i32) -> (i32, i32) {
    %c0_i32 = arith.constant 0 : i32
    %c0_i32_0 = arith.constant 0 : i32
    %c0_i32_1 = arith.constant 0 : i32
    return %c0_i32, %c0_i32_0 : i32, i32
  }
  func.func @transform_10(%arg0: i32) -> (i32, i32, i32) {
    %c0_i32 = arith.constant 0 : i32
    %c0_i32_0 = arith.constant 0 : i32
    %c0_i32_1 = arith.constant 0 : i32
    %c0_i32_2 = arith.constant 0 : i32
    return %c0_i32, %c0_i32_0, %c0_i32_1 : i32, i32, i32
  }
  func.func @transform_11(%arg0: i32) -> (i32, i32, i32) {
    %c0_i32 = arith.constant 0 : i32
    %c0_i32_0 = arith.constant 0 : i32
    %c0_i32_1 = arith.constant 0 : i32
    %c0_i32_2 = arith.constant 0 : i32
    return %c0_i32, %c0_i32_0, %c0_i32_1 : i32, i32, i32
  }
  func.func @transform_12(%arg0: i32) -> (i32, i32) {
    %c0_i32 = arith.constant 0 : i32
    %c0_i32_0 = arith.constant 0 : i32
    %c0_i32_1 = arith.constant 0 : i32
    return %c0_i32, %c0_i32_0 : i32, i32
  }
}

</mosaic_0001>

<bundles_post_ra>
// kernel: text_decoder_forward.1
= control target key start
LH: loop header
LB: loop body
LE: loop exit
PB: predicated region body
PF: predicated region fallthrough
CT: control target
= control target key end

     0   :  { %v1968_v2 = vmov 0.0   ;;  %vm70_vm0 = vcmask 261120   ;;  %vm1969_vm1 = vmmov 0   ;;  %s1970_s22 = smov 64   ;;  %s2404_s0 = inlined_call_operand.vmem [shape: bf16[16,32], index: 0, kind: input, shape index: {}]   ;;  %s2405_s1 = inlined_call_operand.vmem [shape: f32[2,32], index: 1, kind: input, shape index: {}]   ;;  %s2406_s2 = inlined_call_operand.vmem [shape: bf16[32,96], index: 2, kind: input, shape index: {}]   ;;  %s2407_s3 = inlined_call_operand.vmem [shape: f32[1,96], index: 3, kind: input, shape index: {}]   ;;  %s2408_s4 = inlined_call_operand.vmem [shape: bf16[32,96], index: 4, kind: input, shape index: {}]   ;;  %s2409_s5 = inlined_call_operand.vmem [shape: f32[1,32], index: 5, kind: input, shape index: {}]   ;;  %s2410_s6 = inlined_call_operand.vmem [shape: bf16[20,32], index: 6, kind: input, shape index: {}]   ;;  %s2411_s7 = inlined_call_operand.vmem [shape: bf16[32,32], index: 7, kind: input, shape index: {}]   ;;  %s2412_s8 = inlined_call_operand.vmem [shape: bf16[32,32], index: 8, kind: input, shape index: {}]   ;;  %s2413_s9 = inlined_call_operand.vmem [shape: bf16[32,32], index: 9, kind: input, shape index: {}]   ;;  %s2414_s10 = inlined_call_operand.vmem [shape: f32[2,8,32], index: 10, kind: output, shape index: {0}]   ;;  %s2415_s11 = inlined_call_operand.vmem [shape: f32[2,8,10], index: 11, kind: output, shape index: {1}]   ;;  %s2416_s12 = inlined_call_operand.hbm [shape: f32[2,32], index: 12, kind: output, shape index: {2}]  }
   0x1   :  { %v1871_v0 = vld [vmem:[%s2412_s8] sm:$0xff]   ;;  %v1872_v1 = vld [vmem:[%s2412_s8 + $0x8] sm:$0xff]   ;;  %1726 = vmatprep.subr.bf16.mxu1 %v1968_v2  ;;  %1730 = vmatprep.mubr.msk.bf16.mxu1 %vm1969_vm1, %v1968_v2 }
   0x2   :  { %1742 = vmatprep.subr.bf16.mxu0 %v1871_v0  ;;  %v1873_v3 = vld [vmem:[%s2410_s6] sm:$0xff]   ;;  %v2059_v5 = vld [vmem:[%s2410_s6 + $0x8] ss:$0 sps:$4 sm:$0x33]  }
   0x3   :  { %1743 = vmatpush3.bf16.msra.mxu0 %v1871_v0  ;;  %v1874_v4 = vld [vmem:[%s2406_s2] sm:$0xff]   ;;  %1746 = vmatprep.mubr.msk.bf16.mxu0 %vm70_vm0, %v1873_v3  ;;  %v1877_v6 = vld [vmem:[%s2406_s2 + $0x8] sm:$0xff]  }
   0x4   :  { %1744 = vmatprep.subr.bf16.mxu0 %v1872_v1  ;;  %1727 = vmatpush3.bf16.msra.mxu1 %v1874_v4  ;;  %v2068_v7 = vld [vmem:[%s2408_s4] sm:$0xff]   ;;  %v2077_v9 = vld [vmem:[%s2408_s4 + $0x8] sm:$0xff]  }
   0x5   :  { %1728 = vmatprep.subr.bf16.mxu1 %v1968_v2  ;;  %v1879_v8 = vld [vmem:[%s2404_s0] sm:$0xff]  }
   0x6   :  { %v273_v10 = vld [vmem:[%s2405_s1] sm:$0x3] }
   0x7   :  { %1745 = vmatpush3.bf16.msra.mxu0 %v1872_v1  ;;  %v1644_v11 = vld [vmem:[%s2409_s5] ss:$0 sm:$0xff] }
   0x8   :  { %1750 = vmatprep.subr.bf16.mxu0 %v1968_v2  ;;  %1729 = vmatpush3.bf16.msra.mxu1 %v1877_v6 }
   0x9   :  { %342 = vrot.lane.b32.xlu0 %v1644_v11, %s1970_s22 }
   0xa   :  { %1747 = vmatmul.mubr.msk.bf16.vlgmr.msra.gmra.mrb[0].mxu0 %vm70_vm0, %v2059_v5 }
   0xb   :  { %1751 = vmatpush3.bf16.msra.mxu0 %v2068_v7  ;;  %1754 = vmatprep.mubr.msk.bf16.mxu0 %vm1969_vm1, %v1968_v2 }
   0xc   :  { %1752 = vmatprep.subr.bf16.mxu0 %v1968_v2  ;;  %1731 = vmatmul.mubr.msk.bf16.vlgmr.msra.gmra.mrb[0].mxu1 %vm70_vm0, %v1879_v8 }
   0xd   :  { %18 = vsyncpa [#allocation4], 0  ;;  %1738 = vmatprep.mubr.msk.bf16.mxu1 %vm70_vm0, %v1873_v3  ;;  %v274_v12 = vpack.c.bf16 %v273_v10, %v273_v10  ;;  %v1625_v21 = vld [vmem:[%s2407_s3] ss:$0 sm:$0xff]  ;;  %vm1445_vm2 = vcmask 1042432   ;;  %s1971_s3 = smov 32  }
   0xe   :  { %v1880_v44 = vld [vmem:[%s2411_s7] sm:$0xff]   ;;  %v1881_v45 = vld [vmem:[%s2411_s7 + $0x8] sm:$0xff]   ;;  %s1972_s25 = smov 96   ;;  %vm388_vm3 = vcmask 253952   ;;  %vm1246_vm4 = vcmask 1041409   ;;  %vm1249_vm5 = vcmask 1042434  }
   0xf   :  { %1753 = vmatpush3.bf16.msra.mxu0 %v2077_v9  ;;  %1862 = vmatprep.subr.msk.bf16.mxu1 %vm70_vm0, %v1880_v44  ;;  %v147_v46 = vsel %vm70_vm0, %v1880_v44, 0  ;;  %v150_v48 = vsel %vm70_vm0, %v1881_v45, 0  ;;  %vm1252_vm6 = vcmask 1043459   ;;  %vm1255_vm7 = vcmask 1044484   ;;  %s1974_s13 = smov [#allocation3]  }
  0x10   :  { %1766 = vmatprep.subr.bf16.mxu0 %v1968_v2  ;;  %vm1258_vm8 = vcmask 1045509   ;;  %vm1261_vm9 = vcmask 1046534   ;;  %vm1264_vm10 = vcmask 1047559   ;;  %vm1381_vm11 = vcmask 1044480   ;;  %s1613_s14 = sshll.u32 %s1974_s13, 4  ;;  %s1614_s14 = int_to_ptr.vmem [resolvable:$true] %s1613_s14 }
  0x11   :  { %1735 = vmatpush3.bf16.xpose.msra.mxu1 %v147_v46  ;;  %vm1313_vm12 = vcmask 80896   ;;  %vm1103_vm13 = vcmask 261126   ;;  %s1944_s15 = scalar_lea.vmem %s1614_s14, 32  ;;  %p1949_p1 = scmp.lt.s32.totalorder %s1614_s14, %s1614_s14 }
  0x12   :  { %1755 = vmatmul.mubr.msk.bf16.vlgmr.msra.gmra.mrb[4].mxu0 %vm70_vm0, %v274_v12  ;;  %1863 = vmatprep.subr.msk.bf16.mxu1 %vm70_vm0, %v1881_v45  ;;  %p1945_p0 = scmp.ne.s32.totalorder %s1614_s14, %s1944_s15  ;;  %p1950_p2 = scmp.lt.s32.totalorder %s1944_s15, %s1944_s15 }
  0x13   :  { %1767 = vmatpush3.bf16.msra.mxu0 %v2068_v7  ;;  %1770 = vmatprep.mubr.msk.bf16.mxu0 %vm1969_vm1, %v1968_v2 }
  0x14   :  { %1768 = vmatprep.subr.bf16.mxu0 %v1968_v2  ;;  %p1951_p3 = por %p1950_p2, %p1949_p1 }
  0x16   :  { %p1952_p4 = pnand %p1951_p3, %p1945_p0 }
  0x17   :  { %1769 = vmatpush3.bf16.msra.mxu0 %v2077_v9 }
  0x18   :  { %1782 = vmatprep.subr.bf16.mxu0 %v1968_v2 }
  0x19   :  { %1737 = vmatpush3.bf16.xpose.msra.mxu1 %v150_v48 }
  0x1a   :  { %1758 = vmatprep.subr.bf16.mxu1 %v1968_v2 }
  0x20   :  { %1739 = vmatmul.mubr.msk.bf16.vlgmr.msra.gmra.mrb[4].mxu1 %vm70_vm0, %v2059_v5 }
  0x21   :  { %1759 = vmatpush3.bf16.msra.mxu1 %v2068_v7  ;;  %1762 = vmatprep.mubr.msk.bf16.mxu1 %vm1969_vm1, %v1968_v2 }
  0x22   :  { %1760 = vmatprep.subr.bf16.mxu1 %v1968_v2 }
  0x25   :  { %1761 = vmatpush3.bf16.msra.mxu1 %v2077_v9 }
  0x26   :  { %1774 = vmatprep.subr.bf16.mxu1 %v1968_v2 }
  0x7b   :  { %v2111_v27 = vpop.permute.xlu0 %342 }
  0xdd   :  { %v1748_v13 = vpop.f32.mrb[0].mxu0 }
  0xde   :  { %v252_v14 = vpop.f32.mrb[1].mxu0  ;;  %v267_v15 = vpack.c.bf16 %v1748_v13, %v1748_v13 }
  0xdf   :  { %v1749_v16 = vpop.f32.mrb[2].mxu0  ;;  %v108_v17 = vpop.f32.mrb[0].mxu1 }
  0xe0   :  { %v255_v18 = vpop.f32.mrb[3].mxu0  ;;  %v1732_v19 = vpop.f32.mrb[1].mxu1  ;;  %v1550_v25 = vrot.slane %v267_v15, 5  ;;  %v2118_v34 = vadd.f32 %v1625_v21, %v108_v17 }
  0xe1   :  { %v2103_v20 = vpack.c.bf16 %v255_v18, %v252_v14  ;;  %v111_v22 = vpop.f32.mrb[2].mxu1 }
  0xe2   :  { %v2108_v23 = vadd.f32 %v1625_v21, %v111_v22  ;;  %v1733_v24 = vpop.f32.mrb[3].mxu1 }
  0xe3   :  { %v1549_v26 = vrot.slane %v2103_v20, 5 }
  0xe5   :  { %v324_v28 = vpop.f32.mrb[4].mxu0  ;;  %v2114_v29 = vsel %vm1445_vm2, %v1549_v26, %v1550_v25 }
  0xe6   :  { %v345_v30 = vadd.f32 %v2111_v27, %v324_v28  ;;  %v1756_v31 = vpop.f32.mrb[5].mxu0  ;;  %v330_v35 = vadd.f32 %v324_v28, %v2118_v34 }
  0xe7   :  { %v327_v32 = vpop.f32.mrb[6].mxu0 }
  0xe8   :  { %347 = vrot.lane.b32.xlu0 %v345_v30, %s1970_s22  ;;  %v1757_v33 = vpop.f32.mrb[7].mxu0  ;;  %v1643_v36 = vmul.f32 -1.442695, %v330_v35 }
  0xea   :  { %1884 = vpow2.f32 %v1643_v36 }
  0xec   :  { %364 = vrot.lane.b32.xlu0 %v273_v10, %s1971_s3 }
  0xf3   :  { %v1740_v56 = vpop.f32.mrb[4].mxu1 }
  0xf4   :  { %v1885_v37 = vpop.eup %1884  ;;  %v186_v57 = vpop.f32.mrb[5].mxu1  ;;  %v201_v62 = vpack.c.bf16 %v1740_v56, %v1740_v56 }
  0xf5   :  { %v334_v38 = vadd.f32 1.0, %v1885_v37  ;;  %v1741_v58 = vpop.f32.mrb[6].mxu1 }
  0xf6   :  { %v189_v59 = vpop.f32.mrb[7].mxu1  ;;  %v1447_v63 = vrot.slane %v201_v62, 5 }
  0xf7   :  { %1886 = vrcp.f32 %v334_v38  ;;  %v2147_v60 = vpack.c.bf16 %v189_v59, %v186_v57 }
  0xf9   :  { %v1446_v0 = vrot.slane %v2147_v60, 5 }
  0xfb   :  { %v2158_v1 = vsel %vm1445_vm2, %v1446_v0, %v1447_v63 }
 0x101   :  { %v1887_v39 = vpop.eup %1886 }
 0x102   :  { %v357_v50 = vsub.f32 1.0, %v1887_v39 }
 0x15a   :  { %v348_v40 = vpop.permute.xlu0 %347 }
 0x15b   :  { %v350_v41 = vmul.f32 %v1887_v39, %v348_v40 }
 0x15d   :  { %352 = vrot.lane.b32.xlu1 %v350_v41, %s1970_s22 }
 0x15e   :  { %v365_v49 = vpop.permute.xlu0 %364 }
 0x15f   :  { %v367_v52 = vmul.f32 %v1887_v39, %v365_v49 }
 0x1cf   :  { %v353_v42 = vpop.permute.xlu1 %352 }
 0x1d0   :  { %v355_v43 = vadd.f32 %v353_v42, %v2118_v34 }
 0x1d2   :  { %1888 = vtanh.f32 %v355_v43 }
 0x1dc   :  { %v1889_v47 = vpop.eup %1888 }
 0x1dd   :  { %359 = vrot.lane.b32.xlu1 %v1889_v47, %s1972_s25 }
 0x24f   :  { %v360_v51 = vpop.permute.xlu1 %359 }
 0x250   :  { %v362_v53 = vmul.f32 %v360_v51, %v357_v50 }
 0x252   :  { %v368_v54 = vadd.f32 %v367_v52, %v362_v53 }
 0x254   :  { %v2143_v55 = vpack.c.bf16 %v368_v54, %v368_v54  ;;  %v465_v24 = vrot.slane %v368_v54, 6 }
 0x256   :  { %390 = vrot.lane.b32.xlu1 %v2143_v55, %s1972_s25 }
 0x2c8   :  { %v391_v61 = vpop.permute.xlu1 %390 }
 0x2c9   :  { %1763 = vmatmul.mubr.msk.bf16.vlgmr.msra.gmra.mrb[8].mxu1 %vm70_vm0, %v391_v61 }
 0x2ca   :  { %1775 = vmatpush3.bf16.msra.mxu1 %v2068_v7  ;;  %1778 = vmatprep.mubr.msk.bf16.mxu1 %vm1969_vm1, %v1968_v2 }
 0x2cb   :  { %1776 = vmatprep.subr.bf16.mxu1 %v1968_v2 }
 0x2ce   :  { %1777 = vmatpush3.bf16.msra.mxu1 %v2077_v9 }
 0x2cf   :  { %1790 = vmatprep.subr.bf16.mxu1 %v1968_v2 }
 0x39c   :  { %v429_v3 = vpop.f32.mrb[8].mxu1 }
 0x39d   :  { %v445_v4 = vadd.f32 %v429_v3, %v2111_v27  ;;  %v1764_v5 = vpop.f32.mrb[9].mxu1  ;;  %v436_v11 = vrot.slane %v429_v3, 6 }
 0x39e   :  { %v432_v6 = vpop.f32.mrb[10].mxu1 }
 0x39f   :  { %v447_v8 = vrot.slane %v445_v4, 6  ;;  %v1765_v10 = vpop.f32.mrb[11].mxu1  ;;  %v438_v12 = vadd.f32 %v436_v11, %v2118_v34 }
 0x3a1   :  { %448 = vrot.lane.b32.xlu0 %v447_v8, %s1970_s22  ;;  %v1646_v13 = vmul.f32 -1.442695, %v438_v12 }
 0x3a3   :  { %1890 = vpow2.f32 %v1646_v13 }
 0x3ad   :  { %v1891_v14 = vpop.eup %1890 }
 0x3ae   :  { %v442_v15 = vadd.f32 1.0, %v1891_v14 }
 0x3b0   :  { %1892 = vrcp.f32 %v442_v15 }
 0x3ba   :  { %v1893_v16 = vpop.eup %1892 }
 0x3bb   :  { %v458_v25 = vsub.f32 1.0, %v1893_v16  ;;  %v467_v28 = vmul.f32 %v1893_v16, %v465_v24 }
 0x413   :  { %v449_v17 = vpop.permute.xlu0 %448 }
 0x414   :  { %v451_v18 = vmul.f32 %v1893_v16, %v449_v17 }
 0x416   :  { %453 = vrot.lane.b32.xlu1 %v451_v18, %s1970_s22 }
 0x488   :  { %v454_v19 = vpop.permute.xlu1 %453 }
 0x489   :  { %v456_v21 = vadd.f32 %v454_v19, %v2118_v34 }
 0x48b   :  { %1894 = vtanh.f32 %v456_v21 }
 0x495   :  { %v1895_v22 = vpop.eup %1894 }
 0x496   :  { %460 = vrot.lane.b32.xlu0 %v1895_v22, %s1972_s25 }
 0x508   :  { %v461_v26 = vpop.permute.xlu0 %460 }
 0x509   :  { %v463_v30 = vmul.f32 %v461_v26, %v458_v25 }
 0x50b   :  { %v468_v31 = vadd.f32 %v467_v28, %v463_v30 }
 0x50d   :  { %v2166_v32 = vpack.c.bf16 %v468_v31, %v468_v31  ;;  %v567_v53 = vrot.slane %v468_v31, 6 }
 0x50f   :  { %v491_v33 = vrot.slane %v2166_v32, 1 }
 0x511   :  { %492 = vrot.lane.b32.xlu1 %v491_v33, %s1972_s25 }
 0x583   :  { %v493_v35 = vpop.permute.xlu1 %492 }
 0x584   :  { %1771 = vmatmul.mubr.msk.bf16.vlgmr.msra.gmra.mrb[8].mxu0 %vm70_vm0, %v493_v35 }
 0x585   :  { %1783 = vmatpush3.bf16.msra.mxu0 %v2068_v7  ;;  %1786 = vmatprep.mubr.msk.bf16.mxu0 %vm1969_vm1, %v1968_v2 }
 0x586   :  { %1784 = vmatprep.subr.bf16.mxu0 %v1968_v2 }
 0x589   :  { %1785 = vmatpush3.bf16.msra.mxu0 %v2077_v9 }
 0x58a   :  { %1798 = vmatprep.subr.bf16.mxu0 %v1968_v2 }
 0x657   :  { %v531_v36 = vpop.f32.mrb[8].mxu0 }
 0x658   :  { %v547_v37 = vadd.f32 %v531_v36, %v2111_v27  ;;  %v1772_v38 = vpop.f32.mrb[9].mxu0  ;;  %v538_v42 = vrot.slane %v531_v36, 4 }
 0x659   :  { %v534_v39 = vpop.f32.mrb[10].mxu0 }
 0x65a   :  { %v549_v40 = vrot.slane %v547_v37, 4  ;;  %v1773_v41 = vpop.f32.mrb[11].mxu0  ;;  %v540_v43 = vadd.f32 %v538_v42, %v2118_v34 }
 0x65c   :  { %550 = vrot.lane.b32.xlu0 %v549_v40, %s1970_s22  ;;  %v1648_v44 = vmul.f32 -1.442695, %v540_v43 }
 0x65e   :  { %1896 = vpow2.f32 %v1648_v44 }
 0x668   :  { %v1897_v45 = vpop.eup %1896 }
 0x669   :  { %v544_v46 = vadd.f32 1.0, %v1897_v45 }
 0x66b   :  { %1898 = vrcp.f32 %v544_v46 }
 0x675   :  { %v1899_v47 = vpop.eup %1898 }
 0x676   :  { %v560_v54 = vsub.f32 1.0, %v1899_v47  ;;  %v569_v57 = vmul.f32 %v1899_v47, %v567_v53 }
 0x6ce   :  { %v551_v48 = vpop.permute.xlu0 %550 }
 0x6cf   :  { %v553_v49 = vmul.f32 %v1899_v47, %v551_v48 }
 0x6d1   :  { %555 = vrot.lane.b32.xlu1 %v553_v49, %s1970_s22 }
 0x743   :  { %v556_v50 = vpop.permute.xlu1 %555 }
 0x744   :  { %v558_v51 = vadd.f32 %v556_v50, %v2118_v34 }
 0x746   :  { %1900 = vtanh.f32 %v558_v51 }
 0x750   :  { %v1901_v52 = vpop.eup %1900 }
 0x751   :  { %562 = vrot.lane.b32.xlu0 %v1901_v52, %s1972_s25 }
 0x7c3   :  { %v563_v56 = vpop.permute.xlu0 %562 }
 0x7c4   :  { %v565_v58 = vmul.f32 %v563_v56, %v560_v54 }
 0x7c6   :  { %v570_v59 = vadd.f32 %v569_v57, %v565_v58 }
 0x7c8   :  { %v2183_v61 = vpack.c.bf16 %v570_v59, %v570_v59  ;;  %v669_v22 = vrot.slane %v570_v59, 6 }
 0x7ca   :  { %v593_v62 = vrot.slane %v2183_v61, 2 }
 0x7cc   :  { %594 = vrot.lane.b32.xlu1 %v593_v62, %s1972_s25 }
 0x83e   :  { %v595_v63 = vpop.permute.xlu1 %594 }
 0x83f   :  { %1779 = vmatmul.mubr.msk.bf16.vlgmr.msra.gmra.mrb[12].mxu1 %vm70_vm0, %v595_v63 }
 0x840   :  { %1791 = vmatpush3.bf16.msra.mxu1 %v2068_v7  ;;  %1794 = vmatprep.mubr.msk.bf16.mxu1 %vm1969_vm1, %v1968_v2 }
 0x841   :  { %1792 = vmatprep.subr.bf16.mxu1 %v1968_v2 }
 0x844   :  { %1793 = vmatpush3.bf16.msra.mxu1 %v2077_v9 }
 0x845   :  { %1806 = vmatprep.subr.bf16.mxu1 %v1968_v2 }
 0x912   :  { %v633_v0 = vpop.f32.mrb[12].mxu1 }
 0x913   :  { %v649_v3 = vadd.f32 %v633_v0, %v2111_v27  ;;  %v1780_v4 = vpop.f32.mrb[13].mxu1  ;;  %v640_v10 = vrot.slane %v633_v0, 2 }
 0x914   :  { %v636_v5 = vpop.f32.mrb[14].mxu1 }
 0x915   :  { %v651_v6 = vrot.slane %v649_v3, 2  ;;  %v1781_v8 = vpop.f32.mrb[15].mxu1  ;;  %v642_v11 = vadd.f32 %v640_v10, %v2118_v34 }
 0x917   :  { %652 = vrot.lane.b32.xlu0 %v651_v6, %s1970_s22  ;;  %v1650_v12 = vmul.f32 -1.442695, %v642_v11 }
 0x919   :  { %1902 = vpow2.f32 %v1650_v12 }
 0x923   :  { %v1903_v13 = vpop.eup %1902 }
 0x924   :  { %v646_v14 = vadd.f32 1.0, %v1903_v13 }
 0x926   :  { %1904 = vrcp.f32 %v646_v14 }
 0x930   :  { %v1905_v15 = vpop.eup %1904 }
 0x931   :  { %v662_v24 = vsub.f32 1.0, %v1905_v15  ;;  %v671_v26 = vmul.f32 %v1905_v15, %v669_v22 }
 0x989   :  { %v653_v16 = vpop.permute.xlu0 %652 }
 0x98a   :  { %v655_v17 = vmul.f32 %v1905_v15, %v653_v16 }
 0x98c   :  { %657 = vrot.lane.b32.xlu1 %v655_v17, %s1970_s22 }
 0x9fe   :  { %v658_v18 = vpop.permute.xlu1 %657 }
 0x9ff   :  { %v660_v19 = vadd.f32 %v658_v18, %v2118_v34 }
 0xa01   :  { %1906 = vtanh.f32 %v660_v19 }
 0xa0b   :  { %v1907_v21 = vpop.eup %1906 }
 0xa0c   :  { %664 = vrot.lane.b32.xlu0 %v1907_v21, %s1972_s25 }
 0xa7e   :  { %v665_v25 = vpop.permute.xlu0 %664 }
 0xa7f   :  { %v667_v28 = vmul.f32 %v665_v25, %v662_v24 }
 0xa81   :  { %v672_v30 = vadd.f32 %v671_v26, %v667_v28  ;;  %v1271_v28 = vsel %vm70_vm0, %v2147_v60, 0 }
 0xa83   :  { %v2200_v31 = vpack.c.bf16 %v672_v30, %v672_v30  ;;  %v768_v50 = vrot.slane %v672_v30, 6 }
 0xa85   :  { %v696_v33 = vrot.slane %v2200_v31, 3 }
 0xa87   :  { %697 = vrot.lane.b32.xlu1 %v696_v33, %s1972_s25 }
 0xaf9   :  { %v698_v35 = vpop.permute.xlu1 %697 }
 0xafa   :  { %1787 = vmatmul.mubr.msk.bf16.vlgmr.msra.gmra.mrb[12].mxu0 %vm70_vm0, %v698_v35 }
 0xafb   :  { %1799 = vmatpush3.bf16.msra.mxu0 %v2068_v7  ;;  %1802 = vmatprep.mubr.msk.bf16.mxu0 %vm1969_vm1, %v1968_v2 }
 0xafc   :  { %1800 = vmatprep.subr.bf16.mxu0 %v1968_v2 }
 0xaff   :  { %1801 = vmatpush3.bf16.msra.mxu0 %v2077_v9 }
 0xb00   :  { %1814 = vmatprep.subr.bf16.mxu0 %v1968_v2 }
 0xbcd   :  { %v736_v34 = vpop.f32.mrb[12].mxu0 }
 0xbce   :  { %v749_v36 = vadd.f32 %v736_v34, %v2111_v27  ;;  %v1788_v37 = vpop.f32.mrb[13].mxu0  ;;  %v742_v40 = vadd.f32 %v736_v34, %v2108_v23 }
 0xbcf   :  { %v739_v38 = vpop.f32.mrb[14].mxu0 }
 0xbd0   :  { %751 = vrot.lane.b32.xlu0 %v749_v36, %s1970_s22  ;;  %v1789_v39 = vpop.f32.mrb[15].mxu0  ;;  %v1652_v41 = vmul.f32 -1.442695, %v742_v40 }
 0xbd2   :  { %1908 = vpow2.f32 %v1652_v41 }
 0xbdc   :  { %v1909_v42 = vpop.eup %1908 }
 0xbdd   :  { %v746_v43 = vadd.f32 1.0, %v1909_v42 }
 0xbdf   :  { %1910 = vrcp.f32 %v746_v43 }
 0xbe9   :  { %v1911_v44 = vpop.eup %1910 }
 0xbea   :  { %v761_v51 = vsub.f32 1.0, %v1911_v44  ;;  %v770_v53 = vmul.f32 %v1911_v44, %v768_v50 }
 0xc42   :  { %v752_v45 = vpop.permute.xlu0 %751 }
 0xc43   :  { %v754_v46 = vmul.f32 %v1911_v44, %v752_v45 }
 0xc45   :  { %756 = vrot.lane.b32.xlu1 %v754_v46, %s1970_s22 }
 0xcb7   :  { %v757_v47 = vpop.permute.xlu1 %756 }
 0xcb8   :  { %v759_v48 = vadd.f32 %v757_v47, %v2108_v23 }
 0xcba   :  { %1912 = vtanh.f32 %v759_v48 }
 0xcc4   :  { %v1913_v49 = vpop.eup %1912 }
 0xcc5   :  { %763 = vrot.lane.b32.xlu0 %v1913_v49, %s1972_s25 }
 0xd37   :  { %v764_v52 = vpop.permute.xlu0 %763 }
 0xd38   :  { %v766_v54 = vmul.f32 %v764_v52, %v761_v51 }
 0xd3a   :  { %v771_v56 = vadd.f32 %v770_v53, %v766_v54 }
 0xd3c   :  { %v2217_v57 = vpack.c.bf16 %v771_v56, %v771_v56  ;;  %v868_v16 = vrot.slane %v771_v56, 6 }
 0xd3e   :  { %793 = vrot.lane.b32.xlu1 %v2217_v57, %s1972_s25 }
 0xdb0   :  { %v794_v58 = vpop.permute.xlu1 %793 }
 0xdb1   :  { %1795 = vmatmul.mubr.msk.bf16.vlgmr.msra.gmra.mrb[16].mxu1 %vm70_vm0, %v794_v58 }
 0xdb2   :  { %1807 = vmatpush3.bf16.msra.mxu1 %v2068_v7  ;;  %1810 = vmatprep.mubr.msk.bf16.mxu1 %vm1969_vm1, %v1968_v2 }
 0xdb3   :  { %1808 = vmatprep.subr.bf16.mxu1 %v1968_v2 }
 0xdb6   :  { %1809 = vmatpush3.bf16.msra.mxu1 %v2077_v9 }
 0xdb7   :  { %1820 = vmatprep.subr.bf16.mxu1 %v1968_v2 }
 0xe84   :  { %v832_v59 = vpop.f32.mrb[16].mxu1 }
 0xe85   :  { %v848_v62 = vadd.f32 %v832_v59, %v2111_v27  ;;  %v1796_v63 = vpop.f32.mrb[17].mxu1  ;;  %v839_v5 = vrot.slane %v832_v59, 6 }
 0xe86   :  { %v835_v0 = vpop.f32.mrb[18].mxu1 }
 0xe87   :  { %v850_v3 = vrot.slane %v848_v62, 6  ;;  %v1797_v4 = vpop.f32.mrb[19].mxu1  ;;  %v841_v7 = vadd.f32 %v839_v5, %v2108_v23 }
 0xe89   :  { %851 = vrot.lane.b32.xlu0 %v850_v3, %s1970_s22  ;;  %v1654_v6 = vmul.f32 -1.442695, %v841_v7 }
 0xe8b   :  { %1914 = vpow2.f32 %v1654_v6 }
 0xe95   :  { %v1915_v8 = vpop.eup %1914 }
 0xe96   :  { %v845_v10 = vadd.f32 1.0, %v1915_v8 }
 0xe98   :  { %1916 = vrcp.f32 %v845_v10 }
 0xea2   :  { %v1917_v9 = vpop.eup %1916 }
 0xea3   :  { %v861_v17 = vsub.f32 1.0, %v1917_v9  ;;  %v870_v19 = vmul.f32 %v1917_v9, %v868_v16 }
 0xefb   :  { %v852_v11 = vpop.permute.xlu0 %851 }
 0xefc   :  { %v854_v12 = vmul.f32 %v1917_v9, %v852_v11  ;;  %v1973_v9 = vmov 1966171168  }
 0xefd   :  { %v372_v11 = vunpack.c.l.s4 %v1973_v9 }
 0xefe   :  { %856 = vrot.lane.b32.xlu1 %v854_v12, %s1970_s22  ;;  %v374_v12 = vlaneseq }
 0xf70   :  { %v857_v13 = vpop.permute.xlu1 %856 }
 0xf71   :  { %v859_v14 = vadd.f32 %v857_v13, %v2108_v23  ;;  %v373_v13 = vunpack.c.0.s8 %v372_v11 }
 0xf73   :  { %1918 = vtanh.f32 %v859_v14  ;;  %v375_v14 = vshrl.u32 %v374_v12, 7 }
 0xf7d   :  { %v1919_v15 = vpop.eup %1918 }
 0xf7e   :  { %863 = vrot.lane.b32.xlu0 %v1919_v15, %s1972_s25 }
 0xff0   :  { %v864_v18 = vpop.permute.xlu0 %863 }
 0xff1   :  { %v866_v21 = vmul.f32 %v864_v18, %v861_v17 }
 0xff3   :  { %v871_v22 = vadd.f32 %v870_v19, %v866_v21 }
 0xff5   :  { %v2234_v24 = vpack.c.bf16 %v871_v22, %v871_v22  ;;  %v970_v48 = vrot.slane %v871_v22, 6 }
 0xff7   :  { %v894_v25 = vrot.slane %v2234_v24, 1 }
 0xff9   :  { %895 = vrot.lane.b32.xlu1 %v894_v25, %s1972_s25 }
0x106b   :  { %v896_v26 = vpop.permute.xlu1 %895 }
0x106c   :  { %1803 = vmatmul.mubr.msk.bf16.vlgmr.msra.gmra.mrb[16].mxu0 %vm70_vm0, %v896_v26 }
0x106d   :  { %1815 = vmatpush3.bf16.xpose.msra.mxu0 %v1271_v28  ;;  %1816 = vmatprep.mubr.msk.bf16.mxu0 %vm1969_vm1, %v1968_v2 }
0x106e   :  { %1834 = vmatprep.subr.bf16.mxu0 %v1968_v2 }
0x113f   :  { %v934_v30 = vpop.f32.mrb[16].mxu0 }
0x1140   :  { %v950_v33 = vadd.f32 %v934_v30, %v2111_v27  ;;  %v1804_v35 = vpop.f32.mrb[17].mxu0  ;;  %v941_v38 = vrot.slane %v934_v30, 4 }
0x1141   :  { %v937_v34 = vpop.f32.mrb[18].mxu0 }
0x1142   :  { %v952_v36 = vrot.slane %v950_v33, 4  ;;  %v1805_v37 = vpop.f32.mrb[19].mxu0  ;;  %v943_v60 = vadd.f32 %v941_v38, %v2108_v23 }
0x1144   :  { %953 = vrot.lane.b32.xlu0 %v952_v36, %s1970_s22  ;;  %v1656_v39 = vmul.f32 -1.442695, %v943_v60 }
0x1146   :  { %1920 = vpow2.f32 %v1656_v39 }
0x1150   :  { %v1921_v40 = vpop.eup %1920 }
0x1151   :  { %v947_v41 = vadd.f32 1.0, %v1921_v40 }
0x1153   :  { %1922 = vrcp.f32 %v947_v41 }
0x115d   :  { %v1923_v42 = vpop.eup %1922 }
0x115e   :  { %v963_v49 = vsub.f32 1.0, %v1923_v42  ;;  %v972_v51 = vmul.f32 %v1923_v42, %v970_v48 }
0x11b6   :  { %v954_v43 = vpop.permute.xlu0 %953 }
0x11b7   :  { %v956_v44 = vmul.f32 %v1923_v42, %v954_v43 }
0x11b9   :  { %958 = vrot.lane.b32.xlu1 %v956_v44, %s1970_s22 }
0x122b   :  { %v959_v45 = vpop.permute.xlu1 %958 }
0x122c   :  { %v961_v46 = vadd.f32 %v959_v45, %v2108_v23 }
0x122e   :  { %1924 = vtanh.f32 %v961_v46 }
0x1238   :  { %v1925_v47 = vpop.eup %1924 }
0x1239   :  { %965 = vrot.lane.b32.xlu0 %v1925_v47, %s1972_s25 }
0x12ab   :  { %v966_v50 = vpop.permute.xlu0 %965 }
0x12ac   :  { %v968_v52 = vmul.f32 %v966_v50, %v963_v49 }
0x12ae   :  { %v2250_v53 = vadd.f32 %v972_v51, %v968_v52  ;;  %v2309_v52 = vld [vmem:[%s2413_s9 + $0x8] sm:$0xff]  }
0x12b0   :  { %v974_v54 = vpack.c.bf16 %v2250_v53, %v2250_v53  ;;  %v1072_v45 = vrot.slane %v2250_v53, 6 }
0x12b2   :  { %v996_v56 = vrot.slane %v974_v54, 2 }
0x12b4   :  { %997 = vrot.lane.b32.xlu1 %v996_v56, %s1972_s25 }
0x1326   :  { %v998_v58 = vpop.permute.xlu1 %997 }
0x1327   :  { %1811 = vmatmul.mubr.msk.bf16.vlgmr.msra.gmra.mrb[20].mxu1 %vm70_vm0, %v998_v58 }
0x1328   :  { %1824 = vmatprep.mubr.msk.bf16.mxu1 %vm1969_vm1, %v1968_v2 }
0x13fa   :  { %v1036_v59 = vpop.f32.mrb[20].mxu1 }
0x13fb   :  { %v1052_v62 = vadd.f32 %v1036_v59, %v2111_v27  ;;  %v1812_v63 = vpop.f32.mrb[21].mxu1  ;;  %v1043_v5 = vrot.slane %v1036_v59, 2  ;;  %v2261_v27 = vsub.s32 %v373_v13, %v375_v14 }
0x13fc   :  { %v1039_v0 = vpop.f32.mrb[22].mxu1 }
0x13fd   :  { %v1054_v3 = vrot.slane %v1052_v62, 2  ;;  %v1813_v4 = vpop.f32.mrb[23].mxu1  ;;  %v1045_v7 = vadd.f32 %v1043_v5, %v2108_v23  ;;  %v477_v15 = vrot.slane %v2166_v32, %v2261_v27  ;;  %v377_v22 = vrot.slane %v2143_v55, %v2261_v27 }
0x13fe   :  { %v780_v26 = vrot.slane %v2217_v57, %v2261_v27  ;;  %v982_v32 = vrot.slane %v974_v54, %v2261_v27  ;;  %v681_v57 = vrot.slane %v2200_v31, %v2261_v27  ;;  %v579_v37 = vrot.slane %v2183_v61, %v2261_v27 }
0x13ff   :  { %1055 = vrot.lane.b32.xlu0 %v1054_v3, %s1970_s22  ;;  %v1658_v6 = vmul.f32 -1.442695, %v1045_v7  ;;  %v478_v19 = vcombine.high %v477_v15, %v477_v15  ;;  %v384_v25 = vrot.slane %v377_v22, %v2261_v27  ;;  %v880_v31 = vrot.slane %v2234_v24, %v2261_v27  ;;  %v2301_v24 = vld [vmem:[%s2413_s9] sm:$0xff]  }
0x1400   :  { %v787_v28 = vrot.slane %v780_v26, %v2261_v27  ;;  %v989_v30 = vrot.slane %v982_v32, %v2261_v27  ;;  %v586_v60 = vrot.slane %v579_v37, %v2261_v27  ;;  %v682_v39 = vcombine.high %v681_v57, %v681_v57  ;;  %1821 = vmatpush3.bf16.msra.mxu1 %v2301_v24 }
0x1401   :  { %1926 = vpow2.f32 %v1658_v6  ;;  %v485_v21 = vrot.slane %v478_v19, %v2261_v27  ;;  %v881_v43 = vcombine.high %v880_v31, %v880_v31  ;;  %1822 = vmatprep.subr.bf16.mxu1 %v1968_v2 }
0x1402   :  { %v990_v33 = vcombine.high %v989_v30, %v989_v30  ;;  %v587_v41 = vcombine.high %v586_v60, %v586_v60  ;;  %v689_v42 = vrot.slane %v682_v39, %v2261_v27 }
0x1403   :  { %v888_v44 = vrot.slane %v881_v43, %v2261_v27 }
0x1404   :  { %v690_v61 = vcombine.high %v689_v42, %v689_v42  ;;  %1823 = vmatpush3.bf16.msra.mxu1 %v2309_v52 }
0x1405   :  { %1828 = vmatprep.subr.bf16.mxu1 %v1968_v2 }
0x140b   :  { %v1927_v8 = vpop.eup %1926 }
0x140c   :  { %v1049_v10 = vadd.f32 1.0, %v1927_v8 }
0x140e   :  { %1928 = vrcp.f32 %v1049_v10 }
0x1418   :  { %v1929_v16 = vpop.eup %1928 }
0x1419   :  { %v1065_v46 = vsub.f32 1.0, %v1929_v16  ;;  %v1074_v48 = vmul.f32 %v1929_v16, %v1072_v45 }
0x1471   :  { %v1056_v17 = vpop.permute.xlu0 %1055 }
0x1472   :  { %v1058_v18 = vmul.f32 %v1929_v16, %v1056_v17 }
0x1474   :  { %1060 = vrot.lane.b32.xlu1 %v1058_v18, %s1970_s22 }
0x1478   :  { %486 = vrot.lane.b32.xlu1 %v485_v21, %s1972_s25 }
0x147c   :  { %385 = vrot.lane.b32.xlu1 %v384_v25, %s1972_s25 }
0x1480   :  { %788 = vrot.lane.b32.xlu1 %v787_v28, %s1972_s25 }
0x1484   :  { %991 = vrot.lane.b32.xlu1 %v990_v33, %s1972_s25 }
0x14e6   :  { %v1061_v55 = vpop.permute.xlu1 %1060 }
0x14e7   :  { %v1063_v35 = vadd.f32 %v1061_v55, %v2108_v23 }
0x14e9   :  { %1930 = vtanh.f32 %v1063_v35 }
0x14ea   :  { %v487_v34 = vpop.permute.xlu1 %486 }
0x14eb   :  { %490 = vst.msk [vmem:[#allocation2 + $0x1] sm:$0x1] %vm388_vm3, %v487_v34 }
0x14ee   :  { %v386_v36 = vpop.permute.xlu1 %385 }
0x14ef   :  { %389 = vst.msk [vmem:[#allocation2] sm:$0x1] %vm388_vm3, %v386_v36 }
0x14f2   :  { %v789_v38 = vpop.permute.xlu1 %788  ;;  %v1660_v0 = vld.sshfl [vmem:[#allocation2 + $0x1] sm:$0x1 pattern:$0x75316420] }
0x14f3   :  { %v1931_v40 = vpop.eup %1930  ;;  %792 = vst.msk [vmem:[#allocation2 + $0x4] sm:$0x1] %vm388_vm3, %v789_v38  ;;  %v1152_v7 = vrot.slane %v1660_v0, %v2261_v27 }
0x14f4   :  { %1067 = vrot.lane.b32.xlu0 %v1931_v40, %s1972_s25 }
0x14f5   :  { %v1238_v12 = vunpack.c.l.b16 %v1152_v7 }
0x14f6   :  { %v992_v23 = vpop.permute.xlu1 %991  ;;  %v1659_v5 = vld.sshfl [vmem:[#allocation2] sm:$0x1 pattern:$0x75316420] }
0x14f7   :  { %995 = vst.msk [vmem:[#allocation2 + $0x6] sm:$0x1] %vm388_vm3, %v992_v23  ;;  %v1138_v11 = vrot.slane %v1659_v5, %v2261_v27  ;;  %v1245_v21 = vrot.slane %v1238_v12, 7 }
0x14f8   :  { %588 = vrot.lane.b32.xlu0 %v587_v41, %s1972_s25 }
0x14f9   :  { %v1237_v19 = vunpack.c.l.b16 %v1138_v11 }
0x14fa   :  { %v1663_v8 = vld.sshfl [vmem:[#allocation2 + $0x4] sm:$0x1 pattern:$0x75316420] }
0x14fb   :  { %v1194_v14 = vrot.slane %v1663_v8, %v2261_v27  ;;  %v1247_v30 = vsel %vm1246_vm4, %v1245_v21, %v1237_v19  ;;  %v1428_v55 = vrot.slane %v1237_v19, 1 }
0x14fc   :  { %691 = vrot.lane.b32.xlu0 %v690_v61, %s1972_s25 }
0x14fd   :  { %v1241_v25 = vunpack.c.l.b16 %v1194_v14  ;;  %v1429_v42 = vsel %vm1246_vm4, %v1238_v12, %v1428_v55 }
0x14fe   :  { %v1665_v18 = vld.sshfl [vmem:[#allocation2 + $0x6] sm:$0x1 pattern:$0x75316420] }
0x14ff   :  { %v1222_v28 = vrot.slane %v1665_v18, %v2261_v27  ;;  %v1254_v34 = vrot.slane %v1241_v25, 4 }
0x1500   :  { %889 = vrot.lane.b32.xlu0 %v888_v44, %s1972_s25 }
0x1501   :  { %v1243_v37 = vunpack.c.l.b16 %v1222_v28 }
0x1503   :  { %v1260_v31 = vrot.slane %v1243_v37, 2 }
0x1566   :  { %v1068_v47 = vpop.permute.xlu0 %1067 }
0x1567   :  { %v1070_v49 = vmul.f32 %v1068_v47, %v1065_v46 }
0x1569   :  { %v2303_v50 = vadd.f32 %v1074_v48, %v1070_v49 }
0x156a   :  { %v589_v51 = vpop.permute.xlu0 %588 }
0x156b   :  { %v1076_v53 = vpack.c.bf16 %v2303_v50, %v2303_v50  ;;  %592 = vst.msk [vmem:[#allocation2 + $0x2] sm:$0x1] %vm388_vm3, %v589_v51 }
0x156d   :  { %v1084_v54 = vrot.slane %v1076_v53, %v2261_v27 }
0x156e   :  { %v692_v56 = vpop.permute.xlu0 %691 }
0x156f   :  { %695 = vst.msk [vmem:[#allocation2 + $0x3] sm:$0x1] %vm388_vm3, %v692_v56  ;;  %v1085_v58 = vcombine.high %v1084_v54, %v1084_v54  ;;  %v1383_v54 = vsel %vm1381_vm11, %v2103_v20, 0  ;;  %v1453_v56 = vsel %vm70_vm0, %v2158_v1, 0  ;;  %v1556_v1 = vsel %vm1381_vm11, %v2114_v29, 0 }
0x1571   :  { %v1092_v59 = vrot.slane %v1085_v58, %v2261_v27  ;;  %v1438_v58 = vrot.slane %v1243_v37, 3 }
0x1572   :  { %v890_v62 = vpop.permute.xlu0 %889  ;;  %v1661_v3 = vld.sshfl [vmem:[#allocation2 + $0x2] sm:$0x1 pattern:$0x75316420] }
0x1573   :  { %893 = vst.msk [vmem:[#allocation2 + $0x5] sm:$0x1] %vm388_vm3, %v890_v62  ;;  %v1093_v63 = vcombine.high %v1092_v59, %v1092_v59  ;;  %v1166_v6 = vrot.slane %v1661_v3, %v2261_v27 }
0x1575   :  { %1094 = vrot.lane.b32.xlu0 %v1093_v63, %s1972_s25  ;;  %v1239_v13 = vunpack.c.l.b16 %v1166_v6 }
0x1576   :  { %v1662_v4 = vld.sshfl [vmem:[#allocation2 + $0x3] sm:$0x1 pattern:$0x75316420] }
0x1577   :  { %v1180_v10 = vrot.slane %v1662_v4, %v2261_v27  ;;  %v1248_v22 = vrot.slane %v1239_v13, 6  ;;  %v1430_v38 = vrot.slane %v1239_v13, 7 }
0x1579   :  { %v1240_v16 = vunpack.c.l.b16 %v1180_v10  ;;  %v1250_v33 = vsel %vm1249_vm5, %v1248_v22, %v1247_v30  ;;  %v1431_v61 = vsel %vm1249_vm5, %v1430_v38, %v1429_v42 }
0x157a   :  { %v1664_v9 = vld.sshfl [vmem:[#allocation2 + $0x5] sm:$0x1 pattern:$0x75316420] }
0x157b   :  { %v1208_v15 = vrot.slane %v1664_v9, %v2261_v27  ;;  %v1251_v32 = vrot.slane %v1240_v16, 5  ;;  %v1432_v39 = vrot.slane %v1240_v16, 6 }
0x157d   :  { %v1242_v26 = vunpack.c.l.b16 %v1208_v15  ;;  %v1253_v35 = vsel %vm1252_vm6, %v1251_v32, %v1250_v33  ;;  %v1433_v44 = vsel %vm1252_vm6, %v1432_v39, %v1431_v61 }
0x157e   :  { %v1256_v40 = vsel %vm1255_vm7, %v1254_v34, %v1253_v35 }
0x157f   :  { %v1257_v57 = vrot.slane %v1242_v26, 3  ;;  %v1436_v45 = vrot.slane %v1242_v26, 4 }
0x1581   :  { %v1259_v41 = vsel %vm1258_vm8, %v1257_v57, %v1256_v40 }
0x1582   :  { %v1262_v46 = vsel %vm1261_vm9, %v1260_v31, %v1259_v41 }
0x15e7   :  { %v1095_v17 = vpop.permute.xlu0 %1094 }
0x15e8   :  { %1098 = vst.msk [vmem:[#allocation2 + $0x7] sm:$0x1] %vm388_vm3, %v1095_v17 }
0x15ef   :  { %v1666_v36 = vld.sshfl [vmem:[#allocation2 + $0x7] sm:$0x1 pattern:$0x75316420] }
0x15f0   :  { %v1236_v60 = vrot.slane %v1666_v36, %v2261_v27  ;;  %v1434_v27 = vrot.slane %v1241_v25, 5 }
0x15f2   :  { %v1244_v23 = vunpack.c.l.b16 %v1236_v60  ;;  %v1435_v49 = vsel %vm1255_vm7, %v1434_v27, %v1433_v44 }
0x15f3   :  { %v1437_v51 = vsel %vm1258_vm8, %v1436_v45, %v1435_v49 }
0x15f4   :  { %v1263_v43 = vrot.slane %v1244_v23, 1  ;;  %v1440_v53 = vrot.slane %v1244_v23, 2  ;;  %v1439_v59 = vsel %vm1261_vm9, %v1438_v58, %v1437_v51 }
0x15f6   :  { %v1265_v47 = vsel %vm1264_vm10, %v1263_v43, %v1262_v46  ;;  %v1441_v62 = vsel %vm1264_vm10, %v1440_v53, %v1439_v59 }
0x15f7   :  { %v1266_v48 = vpack.c.b16 %v1265_v47, %v1265_v47  ;;  %v1442_v20 = vpack.c.b16 %v1441_v62, %v1441_v62 }
0x15f9   :  { %1817 = vmatmul.mubr.msk.bf16.vlgmr.msra.gmra.mrb[20].mxu0 %vm70_vm0, %v1266_v48  ;;  %1825 = vmatmul.mubr.msk.bf16.vlgmr.msra.gmra.mrb[24].mxu1 %vm70_vm0, %v1266_v48 }
0x15fa   :  { %1829 = vmatpush3.bf16.msra.mxu1 %v1383_v54  ;;  %1835 = vmatpush3.bf16.xpose.msra.mxu0 %v1453_v56 }
0x15fb   :  { %1836 = vmatprep.mubr.msk.bf16.mxu0 %vm1969_vm1, %v1968_v2  ;;  %1840 = vmatprep.subr.bf16.mxu0 %v1968_v2 }
0x15fc   :  { %1830 = vmatprep.mubr.msk.bf16.mxu1 %vm1969_vm1, %v1968_v2 }
0x1601   :  { %1837 = vmatmul.mubr.msk.bf16.vlgmr.msra.gmra.mrb[24].mxu0 %vm70_vm0, %v1442_v20 }
0x1602   :  { %1841 = vmatpush3.bf16.msra.mxu0 %v2301_v24  ;;  %1844 = vmatprep.mubr.msk.bf16.mxu0 %vm1969_vm1, %v1968_v2 }
0x1603   :  { %1842 = vmatprep.subr.bf16.mxu0 %v1968_v2 }
0x1606   :  { %1843 = vmatpush3.bf16.msra.mxu0 %v2309_v52 }
0x1607   :  { %1848 = vmatprep.subr.bf16.mxu0 %v1968_v2 }
0x1609   :  { %1845 = vmatmul.mubr.msk.bf16.vlgmr.msra.gmra.mrb[28].mxu0 %vm70_vm0, %v1442_v20 }
0x160a   :  { %1849 = vmatpush3.bf16.msra.mxu0 %v1556_v1  ;;  %1850 = vmatprep.mubr.msk.bf16.mxu0 %vm1969_vm1, %v1968_v2 }
0x16cc   :  { %v1307_v24 = vpop.f32.mrb[20].mxu0 }
0x16cd   :  { %v1818_v63 = vpop.f32.mrb[21].mxu0  ;;  %v1314_v0 = vsel %vm1313_vm12, %v1307_v24, -inf }
0x16ce   :  { %1315 = vmax.xlane.f32.xlu1 %v1314_v0  ;;  %v1310_v3 = vpop.f32.mrb[22].mxu0 }
0x16cf   :  { %v1819_v4 = vpop.f32.mrb[23].mxu0 }
0x16d4   :  { %v1489_v52 = vpop.f32.mrb[24].mxu0 }
0x16d5   :  { %v1838_v5 = vpop.f32.mrb[25].mxu0  ;;  %v1495_v7 = vsel %vm1313_vm12, %v1489_v52, -inf }
0x16d6   :  { %1496 = vmax.xlane.f32.xlu0 %v1495_v7  ;;  %v1492_v6 = vpop.f32.mrb[26].mxu0 }
0x16d7   :  { %v1839_v8 = vpop.f32.mrb[27].mxu0 }
0x175b   :  { %v1316_v29 = vpop.xlane.xlu1 %1315 }
0x175c   :  { %v1317_v10 = vsub.f32 %v1307_v24, %v1316_v29 }
0x175e   :  { %v1318_v9 = vmul.f32 1.442695, %v1317_v10 }
0x1760   :  { %1932 = vpow2.f32 %v1318_v9 }
0x1763   :  { %v1497_v2 = vpop.xlane.xlu0 %1496 }
0x1764   :  { %v1498_v11 = vsub.f32 %v1489_v52, %v1497_v2 }
0x1766   :  { %v1499_v12 = vmul.f32 1.442695, %v1498_v11 }
0x1768   :  { %1934 = vpow2.f32 %v1499_v12 }
0x176a   :  { %v1933_v13 = vpop.eup %1932 }
0x176b   :  { %v1320_v14 = vsel %vm1313_vm12, %v1933_v13, 0.0 }
0x176c   :  { %1321 = vadd.xlane.f32.xlu0 %v1320_v14 }
0x1772   :  { %v1935_v15 = vpop.eup %1934 }
0x1773   :  { %v1501_v16 = vsel %vm1313_vm12, %v1935_v15, 0.0 }
0x1774   :  { %1502 = vadd.xlane.f32.xlu1 %v1501_v16 }
0x1782   :  { %1100 = vrot.lane.b32.xlu0 %v2303_v50, %s1972_s25 }
0x17f9   :  { %v1322_v17 = vpop.xlane.xlu0 %1321 }
0x17fa   :  { %1936 = vrcp.f32 %v1322_v17 }
0x17fd   :  { %v1101_v18 = vpop.permute.xlu0 %1100 }
0x17fe   :  { %1104 = vst.msk [vmem:[#allocation3 - $0x6] sm:$0xc0] %vm1103_vm13, %v1101_v18 }
0x1801   :  { %v1503_v19 = vpop.xlane.xlu1 %1502 }
0x1802   :  { %1938 = vrcp.f32 %v1503_v19 }
0x1804   :  { %v1937_v21 = vpop.eup %1936 }
0x1805   :  { %v1324_v22 = vmul.f32 %v1937_v21, %v1933_v13 }
0x1807   :  { %1427 = vst.msk [vmem:[%s2415_s11] sm:$0xff] %vm1313_vm12, %v1324_v22  ;;  %v1325_v25 = vpack.c.bf16 %v1324_v22, %v1324_v22 }
0x1809   :  { %1831 = vmatmul.mubr.msk.bf16.vlgmr.msra.gmra.mrb[24].mxu1 %vm1313_vm12, %v1325_v25 }
0x180c   :  { %v1939_v26 = vpop.eup %1938 }
0x180d   :  { %v1505_v32 = vmul.f32 %v1939_v26, %v1935_v15 }
0x180f   :  { %1676 = vst.msk [vmem:[%s2415_s11 + $0x8] sm:$0xff] %vm1313_vm12, %v1505_v32  ;;  %v1506_v50 = vpack.c.bf16 %v1505_v32, %v1505_v32 }
0x1811   :  { %1851 = vmatmul.mubr.msk.bf16.vlgmr.msra.gmra.mrb[28].mxu0 %vm1313_vm12, %v1506_v50 }
0x1812   :  { %1955 = shalt.err (!%p1952_p4)
}
0x1813   :  { %s1956_s6 = scalar_lea.hbm %s2416_s12, 32 }
0x1814   :  { %p1957_p5 = scmp.ne.s32.totalorder %s2416_s12, %s1956_s6  ;;  %p1960_p6 = scmp.lt.u32.totalorder %s1956_s6, %s2416_s12 }
0x1816   :  { %p1962_p7 = pnand %p1960_p6, %p1957_p5 }
0x1818   :  { %1965 = shalt.err (!%p1962_p7)
}
0x1819   :  { %1616 = dma.vmem_to_hbm [thread:$0]  %s1614_s14, 32, %s2416_s12, [#allocation4]  }
0x18dc   :  { %v1419_v28 = vpop.f32.mrb[24].mxu1 }
0x18dd   :  { %1940 = vtanh.f32 %v1419_v28  ;;  %v1832_v30 = vpop.f32.mrb[25].mxu1 }
0x18de   :  { %v1422_v33 = vpop.f32.mrb[26].mxu1 }
0x18df   :  { %v1833_v55 = vpop.f32.mrb[27].mxu1 }
0x18e4   :  { %v1592_v35 = vpop.f32.mrb[28].mxu0 }
0x18e5   :  { %1942 = vtanh.f32 %v1592_v35  ;;  %v1852_v34 = vpop.f32.mrb[29].mxu0 }
0x18e6   :  { %v1595_v57 = vpop.f32.mrb[30].mxu0 }
0x18e7   :  { %v1941_v36 = vpop.eup %1940  ;;  %v1853_v37 = vpop.f32.mrb[31].mxu0 }
0x18e8   :  { %1426 = vst.msk [vmem:[%s2414_s10] sm:$0xff] %vm70_vm0, %v1941_v36 }
0x18ef   :  { %v1943_v38 = vpop.eup %1942 }
0x18f0   :  { %1675 = vst.msk [vmem:[%s2414_s10 + $0x8] sm:$0xff] %vm70_vm0, %v1943_v38 }
0x18f1   :  { %1966 = dma.done.wait [#allocation4], 32  }
0x18f2   :  { %1967 = vsyncadd [#allocation4], 4294967264 }
0x18f3   :  { %1624 = vsyncpa [#allocation4], 1 }

</bundles_post_ra>
